<compile_context>
chip_gen: v7x
topology: tpu7x:2x2x1
jax: 0.10.0
libtpu: 0.0.40
codegen_flags: <defaults>
</compile_context>

<pallas_src>
import functools

import jax
import jax.numpy as jnp
from jax import lax
from jax.experimental import pallas as pl
from jax.experimental.pallas import tpu as pltpu


def _convblock_kernel(x_ref, w_ref, shift_ref, o_ref, *, stride, neg_slope):
    # x_ref:     (SLAB_H, W_pad, Cin)    overlapping row-slab of the padded input
    # w_ref:     (KH, KW, Cin, tn)       BN-scale-folded conv weights (Cout tile)
    # shift_ref: (1, tn)                 folded BN shift = beta - mean * scale
    # o_ref:     (TOH, OW, tn)           output tile (lane-dense last dim)
    toh, ow, tn = o_ref.shape
    kh_sz, kw_sz, cin, _ = w_ref.shape

    slab = x_ref[...]                       # whole slab into vregs/VMEM
    w = w_ref[...]

    acc = jnp.zeros((toh * ow, tn), jnp.float32)
    # Static (unrolled) loop over the KH*KW filter taps: each tap is a shifted
    # (TOH*OW, Cin) @ (Cin, tn) MXU matmul accumulated in f32.
    for kh in range(kh_sz):
        for kw in range(kw_sz):
            xs = slab[kh: kh + (toh - 1) * stride + 1: stride,
                      kw: kw + (ow - 1) * stride + 1: stride, :]   # (TOH, OW, Cin)
            a = xs.reshape(toh * ow, cin)
            acc = acc + jnp.dot(a, w[kh, kw],
                                preferred_element_type=jnp.float32)

    y = acc + shift_ref[...]                # BN shift (scale already in weights)
    y = jnp.where(y > 0, y, neg_slope * y)  # LeakyReLU(0.1)
    o_ref[...] = y.reshape(toh, ow, tn).astype(o_ref.dtype)


def conv_block_pallas(x_nchw, weight, gamma, beta, running_mean, running_var,
                      *, stride, padding, eps=1e-5, neg_slope=0.1,
                      toh=32, tn=128, compute_dtype=jnp.float32):
    """Conv2d(bias=False) -> BatchNorm2d(eval) -> LeakyReLU(0.1).

    x_nchw: (N, Cin, H, W) float32
    weight: (Cout, Cin, KH, KW) float32 (PyTorch conv weight layout)
    returns: (N, Cout, OH, OW) float32

    toh:           output rows per grid step (bounds VMEM; slab = toh*stride+KH-1 rows)
    tn:            Cout tile (multiple of 128, lane-dense)
    compute_dtype: jnp.float32 (default) or jnp.bfloat16 on v6e/v7x for MXU peak.
    """
    N, Cin, H, W = x_nchw.shape
    Cout, _, KH, KW = weight.shape

    OH = (H + 2 * padding - KH) // stride + 1
    OW = (W + 2 * padding - KW) // stride + 1

    # ---- NCHW -> NHWC, spatial zero-pad --------------------------------------
    # TODO(synk): keep NHWC end-to-end / fuse these transposes into neighbors if
    # the surrounding model allows; kept here to preserve the NCHW interface.
    x = jnp.transpose(x_nchw, (0, 2, 3, 1))                       # (N, H, W, Cin)
    x = jnp.pad(x, ((0, 0), (padding, padding), (padding, padding), (0, 0)))
    H_pad, W_pad = H + 2 * padding, W + 2 * padding

    # ---- output-row tiling ----------------------------------------------------
    toh = max(1, min(toh, OH))
    T = (OH + toh - 1) // toh
    OH_pad = T * toh
    slab_h = (toh - 1) * stride + KH
    rows_needed = (T - 1) * toh * stride + slab_h
    if rows_needed > H_pad:                                       # bottom zero rows
        x = jnp.pad(x, ((0, 0), (0, rows_needed - H_pad), (0, 0), (0, 0)))

    # Overlapping row-slabs (T slabs, ~(toh+KH-1)/toh duplication, NOT KH*KW x):
    # slabs[n, t] = x_pad[n, t*toh*stride : t*toh*stride + slab_h]
    slabs = jnp.stack(
        [x[:, t * toh * stride: t * toh * stride + slab_h] for t in range(T)],
        axis=1)                                                   # (N, T, slab_h, W_pad, Cin)

    # ---- weights: fold BN scale, pad Cout to lane-dense multiple of 128 -------
    scale = gamma / jnp.sqrt(running_var + eps)                   # (Cout,)
    shift = beta - running_mean * scale                           # (Cout,)
    w = jnp.transpose(weight, (2, 3, 1, 0)) * scale[None, None, None, :]  # (KH,KW,Cin,Cout)

    cout_pad = ((Cout + tn - 1) // tn) * tn
    if cout_pad != Cout:
        w = jnp.pad(w, ((0, 0), (0, 0), (0, 0), (0, cout_pad - Cout)))
        shift = jnp.pad(shift, (0, cout_pad - Cout))
    shift2d = shift.reshape(1, cout_pad).astype(jnp.float32)

    slabs = slabs.astype(compute_dtype)
    w = w.astype(compute_dtype)

    grid = (N, T, cout_pad // tn)
    kernel = functools.partial(_convblock_kernel, stride=stride, neg_slope=neg_slope)

    out = pl.pallas_call(
        kernel,
        out_shape=jax.ShapeDtypeStruct((N, T, toh, OW, cout_pad), x_nchw.dtype),
        grid_spec=pltpu.PrefetchScalarGridSpec(
            num_scalar_prefetch=0,
            grid=grid,
            in_specs=[
                # overlapping input slab for (sample n, row-tile t)
                pl.BlockSpec((None, None, slab_h, W_pad, Cin),
                             lambda n, t, j: (n, t, 0, 0, 0)),
                # folded weights for Cout tile j
                pl.BlockSpec((KH, KW, Cin, tn), lambda n, t, j: (0, 0, 0, j)),
                # BN shift for Cout tile j
                pl.BlockSpec((1, tn), lambda n, t, j: (0, j)),
            ],
            out_specs=pl.BlockSpec((None, None, toh, OW, tn),
                                   lambda n, t, j: (n, t, 0, 0, j)),
        ),
        compiler_params=pltpu.CompilerParams(
            dimension_semantics=("parallel", "parallel", "parallel"),
            vmem_limit_bytes=32 * 1024 * 1024),
    )(slabs, w, shift2d)

    # (N, T, toh, OW, cout_pad) -> (N, OH, OW, Cout) -> NCHW
    out = out.reshape(N, OH_pad, OW, cout_pad)[:, :OH, :, :Cout]
    return jnp.transpose(out, (0, 3, 1, 2))


def _reference(x_nchw, weight, gamma, beta, running_mean, running_var,
               *, stride, padding, eps=1e-5, neg_slope=0.1):
    y = lax.conv_general_dilated(
        x_nchw, weight,
        window_strides=(stride, stride),
        padding=[(padding, padding), (padding, padding)],
        dimension_numbers=("NCHW", "OIHW", "NCHW"))
    scale = (gamma / jnp.sqrt(running_var + eps)).reshape(1, -1, 1, 1)
    shift = (beta - running_mean * gamma / jnp.sqrt(running_var + eps)).reshape(1, -1, 1, 1)
    y = y * scale + shift
    return jnp.where(y > 0, y, neg_slope * y)


if __name__ == "__main__":
    key = jax.random.PRNGKey(0)
    k1, k2, k3, k4, k5, k6 = jax.random.split(key, 6)

    # Small shapes consistent with ConvBlock(in=4, out=8, kernel=3, stride=1, pad=1)
    N, Cin, H, W = 2, 4, 16, 16
    Cout, KH, KW = 8, 3, 3
    stride, padding = 1, 1

    x = jax.random.normal(k1, (N, Cin, H, W), dtype=jnp.float32)
    weight = 0.1 * jax.random.normal(k2, (Cout, Cin, KH, KW), dtype=jnp.float32)
    gamma = 1.0 + 0.1 * jax.random.normal(k3, (Cout,), dtype=jnp.float32)
    beta = 0.1 * jax.random.normal(k4, (Cout,), dtype=jnp.float32)
    running_mean = 0.1 * jax.random.normal(k5, (Cout,), dtype=jnp.float32)
    running_var = 0.5 + jnp.abs(jax.random.normal(k6, (Cout,), dtype=jnp.float32))

    out = conv_block_pallas(x, weight, gamma, beta, running_mean, running_var,
                            stride=stride, padding=padding)
    out = jax.block_until_ready(out)

    ref = _reference(x, weight, gamma, beta, running_mean, running_var,
                     stride=stride, padding=padding)
    assert out.shape == (N, Cout, H, W), out.shape
    assert jnp.allclose(out, ref, rtol=1e-4, atol=1e-4), "mismatch vs reference"

    print("KERNEL_OK")
</pallas_src>

<mosaic_0001>
module attributes {stable_mosaic.version = 11 : i64} {
  func.func @_convblock_kernel(%arg0: i32, %arg1: i32, %arg2: i32, %arg3: memref<1x1x18x18x4xf32, #tpu.memory_space<vmem>>, %arg4: memref<3x3x4x128xf32, #tpu.memory_space<vmem>>, %arg5: memref<1x128xf32, #tpu.memory_space<vmem>>, %arg6: memref<1x1x16x16x128xf32, #tpu.memory_space<vmem>>) attributes {dimension_semantics = [#tpu.dimension_semantics<parallel>, #tpu.dimension_semantics<parallel>, #tpu.dimension_semantics<parallel>], iteration_bounds = array<i64: 2, 1, 1>, scalar_prefetch = 0 : i64, scratch_operands = 0 : i64, tpu.core_type = #tpu.core_type<tc>, window_params = [{transform_indices = @transform_0, window_bounds = array<i64: 1, 1, 18, 18, 4>}, {transform_indices = @transform_1, window_bounds = array<i64: 3, 3, 4, 128>}, {transform_indices = @transform_2, window_bounds = array<i64: 1, 128>}, {transform_indices = @transform_3, window_bounds = array<i64: 1, 1, 16, 16, 128>}]} {
    %c0 = arith.constant 0 : index
    %c0_0 = arith.constant 0 : index
    %c0_1 = arith.constant 0 : index
    %c0_2 = arith.constant 0 : index
    %c0_3 = arith.constant 0 : index
    %0 = vector.load %arg3[%c0, %c0_0, %c0_1, %c0_2, %c0_3] : memref<1x1x18x18x4xf32, #tpu.memory_space<vmem>>, vector<1x1x18x18x4xf32>
    %1 = vector.shape_cast %0 : vector<1x1x18x18x4xf32> to vector<18x18x4xf32>
    %c0_4 = arith.constant 0 : index
    %c0_5 = arith.constant 0 : index
    %c0_6 = arith.constant 0 : index
    %c0_7 = arith.constant 0 : index
    %2 = vector.load %arg4[%c0_4, %c0_5, %c0_6, %c0_7] : memref<3x3x4x128xf32, #tpu.memory_space<vmem>>, vector<3x3x4x128xf32>
    %cst = arith.constant 0.000000e+00 : f32
    %3 = vector.broadcast %cst : f32 to vector<256x128xf32>
    %4 = vector.extract_strided_slice %1 {offsets = [0, 0, 0], sizes = [16, 16, 4], strides = [1, 1, 1]} : vector<18x18x4xf32> to vector<16x16x4xf32>
    %5 = vector.shape_cast %4 : vector<16x16x4xf32> to vector<256x4xf32>
    %6 = vector.extract_strided_slice %2 {offsets = [0, 0, 0, 0], sizes = [1, 1, 4, 128], strides = [1, 1, 1, 1]} : vector<3x3x4x128xf32> to vector<1x1x4x128xf32>
    %7 = vector.shape_cast %6 : vector<1x1x4x128xf32> to vector<4x128xf32>
    %cst_8 = arith.constant dense<0.000000e+00> : vector<256x128xf32>
    %8 = tpu.matmul %5, %7, %cst_8 {dimension_numbers = #tpu.dot_dimension_numbers<[1], [0], [0], [1], [0, 0, 1, 1], [], []>} : vector<256x4xf32>, vector<4x128xf32>, vector<256x128xf32> -> vector<256x128xf32>
    %9 = arith.addf %3, %8 : vector<256x128xf32>
    %10 = vector.extract_strided_slice %1 {offsets = [0, 1, 0], sizes = [16, 16, 4], strides = [1, 1, 1]} : vector<18x18x4xf32> to vector<16x16x4xf32>
    %11 = vector.shape_cast %10 : vector<16x16x4xf32> to vector<256x4xf32>
    %12 = vector.extract_strided_slice %2 {offsets = [0, 1, 0, 0], sizes = [1, 1, 4, 128], strides = [1, 1, 1, 1]} : vector<3x3x4x128xf32> to vector<1x1x4x128xf32>
    %13 = vector.shape_cast %12 : vector<1x1x4x128xf32> to vector<4x128xf32>
    %cst_9 = arith.constant dense<0.000000e+00> : vector<256x128xf32>
    %14 = tpu.matmul %11, %13, %cst_9 {dimension_numbers = #tpu.dot_dimension_numbers<[1], [0], [0], [1], [0, 0, 1, 1], [], []>} : vector<256x4xf32>, vector<4x128xf32>, vector<256x128xf32> -> vector<256x128xf32>
    %15 = arith.addf %9, %14 : vector<256x128xf32>
    %16 = vector.extract_strided_slice %1 {offsets = [0, 2, 0], sizes = [16, 16, 4], strides = [1, 1, 1]} : vector<18x18x4xf32> to vector<16x16x4xf32>
    %17 = vector.shape_cast %16 : vector<16x16x4xf32> to vector<256x4xf32>
    %18 = vector.extract_strided_slice %2 {offsets = [0, 2, 0, 0], sizes = [1, 1, 4, 128], strides = [1, 1, 1, 1]} : vector<3x3x4x128xf32> to vector<1x1x4x128xf32>
    %19 = vector.shape_cast %18 : vector<1x1x4x128xf32> to vector<4x128xf32>
    %cst_10 = arith.constant dense<0.000000e+00> : vector<256x128xf32>
    %20 = tpu.matmul %17, %19, %cst_10 {dimension_numbers = #tpu.dot_dimension_numbers<[1], [0], [0], [1], [0, 0, 1, 1], [], []>} : vector<256x4xf32>, vector<4x128xf32>, vector<256x128xf32> -> vector<256x128xf32>
    %21 = arith.addf %15, %20 : vector<256x128xf32>
    %22 = vector.extract_strided_slice %1 {offsets = [1, 0, 0], sizes = [16, 16, 4], strides = [1, 1, 1]} : vector<18x18x4xf32> to vector<16x16x4xf32>
    %23 = vector.shape_cast %22 : vector<16x16x4xf32> to vector<256x4xf32>
    %24 = vector.extract_strided_slice %2 {offsets = [1, 0, 0, 0], sizes = [1, 1, 4, 128], strides = [1, 1, 1, 1]} : vector<3x3x4x128xf32> to vector<1x1x4x128xf32>
    %25 = vector.shape_cast %24 : vector<1x1x4x128xf32> to vector<4x128xf32>
    %cst_11 = arith.constant dense<0.000000e+00> : vector<256x128xf32>
    %26 = tpu.matmul %23, %25, %cst_11 {dimension_numbers = #tpu.dot_dimension_numbers<[1], [0], [0], [1], [0, 0, 1, 1], [], []>} : vector<256x4xf32>, vector<4x128xf32>, vector<256x128xf32> -> vector<256x128xf32>
    %27 = arith.addf %21, %26 : vector<256x128xf32>
    %28 = vector.extract_strided_slice %1 {offsets = [1, 1, 0], sizes = [16, 16, 4], strides = [1, 1, 1]} : vector<18x18x4xf32> to vector<16x16x4xf32>
    %29 = vector.shape_cast %28 : vector<16x16x4xf32> to vector<256x4xf32>
    %30 = vector.extract_strided_slice %2 {offsets = [1, 1, 0, 0], sizes = [1, 1, 4, 128], strides = [1, 1, 1, 1]} : vector<3x3x4x128xf32> to vector<1x1x4x128xf32>
    %31 = vector.shape_cast %30 : vector<1x1x4x128xf32> to vector<4x128xf32>
    %cst_12 = arith.constant dense<0.000000e+00> : vector<256x128xf32>
    %32 = tpu.matmul %29, %31, %cst_12 {dimension_numbers = #tpu.dot_dimension_numbers<[1], [0], [0], [1], [0, 0, 1, 1], [], []>} : vector<256x4xf32>, vector<4x128xf32>, vector<256x128xf32> -> vector<256x128xf32>
    %33 = arith.addf %27, %32 : vector<256x128xf32>
    %34 = vector.extract_strided_slice %1 {offsets = [1, 2, 0], sizes = [16, 16, 4], strides = [1, 1, 1]} : vector<18x18x4xf32> to vector<16x16x4xf32>
    %35 = vector.shape_cast %34 : vector<16x16x4xf32> to vector<256x4xf32>
    %36 = vector.extract_strided_slice %2 {offsets = [1, 2, 0, 0], sizes = [1, 1, 4, 128], strides = [1, 1, 1, 1]} : vector<3x3x4x128xf32> to vector<1x1x4x128xf32>
    %37 = vector.shape_cast %36 : vector<1x1x4x128xf32> to vector<4x128xf32>
    %cst_13 = arith.constant dense<0.000000e+00> : vector<256x128xf32>
    %38 = tpu.matmul %35, %37, %cst_13 {dimension_numbers = #tpu.dot_dimension_numbers<[1], [0], [0], [1], [0, 0, 1, 1], [], []>} : vector<256x4xf32>, vector<4x128xf32>, vector<256x128xf32> -> vector<256x128xf32>
    %39 = arith.addf %33, %38 : vector<256x128xf32>
    %40 = vector.extract_strided_slice %1 {offsets = [2, 0, 0], sizes = [16, 16, 4], strides = [1, 1, 1]} : vector<18x18x4xf32> to vector<16x16x4xf32>
    %41 = vector.shape_cast %40 : vector<16x16x4xf32> to vector<256x4xf32>
    %42 = vector.extract_strided_slice %2 {offsets = [2, 0, 0, 0], sizes = [1, 1, 4, 128], strides = [1, 1, 1, 1]} : vector<3x3x4x128xf32> to vector<1x1x4x128xf32>
    %43 = vector.shape_cast %42 : vector<1x1x4x128xf32> to vector<4x128xf32>
    %cst_14 = arith.constant dense<0.000000e+00> : vector<256x128xf32>
    %44 = tpu.matmul %41, %43, %cst_14 {dimension_numbers = #tpu.dot_dimension_numbers<[1], [0], [0], [1], [0, 0, 1, 1], [], []>} : vector<256x4xf32>, vector<4x128xf32>, vector<256x128xf32> -> vector<256x128xf32>
    %45 = arith.addf %39, %44 : vector<256x128xf32>
    %46 = vector.extract_strided_slice %1 {offsets = [2, 1, 0], sizes = [16, 16, 4], strides = [1, 1, 1]} : vector<18x18x4xf32> to vector<16x16x4xf32>
    %47 = vector.shape_cast %46 : vector<16x16x4xf32> to vector<256x4xf32>
    %48 = vector.extract_strided_slice %2 {offsets = [2, 1, 0, 0], sizes = [1, 1, 4, 128], strides = [1, 1, 1, 1]} : vector<3x3x4x128xf32> to vector<1x1x4x128xf32>
    %49 = vector.shape_cast %48 : vector<1x1x4x128xf32> to vector<4x128xf32>
    %cst_15 = arith.constant dense<0.000000e+00> : vector<256x128xf32>
    %50 = tpu.matmul %47, %49, %cst_15 {dimension_numbers = #tpu.dot_dimension_numbers<[1], [0], [0], [1], [0, 0, 1, 1], [], []>} : vector<256x4xf32>, vector<4x128xf32>, vector<256x128xf32> -> vector<256x128xf32>
    %51 = arith.addf %45, %50 : vector<256x128xf32>
    %52 = vector.extract_strided_slice %1 {offsets = [2, 2, 0], sizes = [16, 16, 4], strides = [1, 1, 1]} : vector<18x18x4xf32> to vector<16x16x4xf32>
    %53 = vector.shape_cast %52 : vector<16x16x4xf32> to vector<256x4xf32>
    %54 = vector.extract_strided_slice %2 {offsets = [2, 2, 0, 0], sizes = [1, 1, 4, 128], strides = [1, 1, 1, 1]} : vector<3x3x4x128xf32> to vector<1x1x4x128xf32>
    %55 = vector.shape_cast %54 : vector<1x1x4x128xf32> to vector<4x128xf32>
    %cst_16 = arith.constant dense<0.000000e+00> : vector<256x128xf32>
    %56 = tpu.matmul %53, %55, %cst_16 {dimension_numbers = #tpu.dot_dimension_numbers<[1], [0], [0], [1], [0, 0, 1, 1], [], []>} : vector<256x4xf32>, vector<4x128xf32>, vector<256x128xf32> -> vector<256x128xf32>
    %57 = arith.addf %51, %56 : vector<256x128xf32>
    %c0_17 = arith.constant 0 : index
    %c0_18 = arith.constant 0 : index
    %58 = vector.load %arg5[%c0_17, %c0_18] : memref<1x128xf32, #tpu.memory_space<vmem>>, vector<1x128xf32>
    %59 = vector.broadcast %58 : vector<1x128xf32> to vector<256x128xf32>
    %60 = arith.addf %57, %59 : vector<256x128xf32>
    %cst_19 = arith.constant 0.000000e+00 : f32
    %61 = vector.broadcast %cst_19 : f32 to vector<256x128xf32>
    %62 = arith.cmpf ogt, %60, %61 : vector<256x128xf32>
    %cst_20 = arith.constant 1.000000e-01 : f32
    %63 = vector.broadcast %cst_20 : f32 to vector<256x128xf32>
    %64 = arith.mulf %63, %60 : vector<256x128xf32>
    %65 = arith.select %62, %60, %64 : vector<256x128xi1>, vector<256x128xf32>
    %66 = vector.shape_cast %65 : vector<256x128xf32> to vector<16x16x128xf32>
    %c0_21 = arith.constant 0 : index
    %c0_22 = arith.constant 0 : index
    %c0_23 = arith.constant 0 : index
    %c0_24 = arith.constant 0 : index
    %c0_25 = arith.constant 0 : index
    %67 = vector.load %arg6[%c0_21, %c0_22, %c0_23, %c0_24, %c0_25] : memref<1x1x16x16x128xf32, #tpu.memory_space<vmem>>, vector<1x1x16x16x128xf32>
    %68 = vector.shape_cast %67 : vector<1x1x16x16x128xf32> to vector<16x16x128xf32>
    %69 = vector.shape_cast %66 : vector<16x16x128xf32> to vector<1x1x16x16x128xf32>
    tpu.vector_store %arg6[%c0_21, %c0_22, %c0_23, %c0_24, %c0_25], %69 {strides = array<i32>} : memref<1x1x16x16x128xf32, #tpu.memory_space<vmem>>, vector<1x1x16x16x128xf32>,
    return
  }
  func.func @transform_0(%arg0: i32, %arg1: i32, %arg2: i32) -> (i32, i32, i32, i32, i32) {
    %c0_i32 = arith.constant 0 : i32
    %c0_i32_0 = arith.constant 0 : i32
    %c0_i32_1 = arith.constant 0 : i32
    %c0_i32_2 = arith.constant 0 : i32
    return %arg0, %arg1, %c0_i32, %c0_i32_0, %c0_i32_1 : i32, i32, i32, i32, i32
  }
  func.func @transform_1(%arg0: i32, %arg1: i32, %arg2: i32) -> (i32, i32, i32, i32) {
    %c0_i32 = arith.constant 0 : i32
    %c0_i32_0 = arith.constant 0 : i32
    %c0_i32_1 = arith.constant 0 : i32
    %c0_i32_2 = arith.constant 0 : i32
    return %c0_i32, %c0_i32_0, %c0_i32_1, %arg2 : i32, i32, i32, i32
  }
  func.func @transform_2(%arg0: i32, %arg1: i32, %arg2: i32) -> (i32, i32) {
    %c0_i32 = arith.constant 0 : i32
    %c0_i32_0 = arith.constant 0 : i32
    return %c0_i32, %arg2 : i32, i32
  }
  func.func @transform_3(%arg0: i32, %arg1: i32, %arg2: i32) -> (i32, i32, i32, i32, i32) {
    %c0_i32 = arith.constant 0 : i32
    %c0_i32_0 = arith.constant 0 : i32
    %c0_i32_1 = arith.constant 0 : i32
    return %arg0, %arg1, %c0_i32, %c0_i32_0, %arg2 : i32, i32, i32, i32, i32
  }
}

</mosaic_0001>

<bundles_post_ra>
// kernel: tpu_custom_call.1
= control target key start
LH: loop header
LB: loop body
LE: loop exit
PB: predicated region body
PF: predicated region fallthrough
CT: control target
= control target key end

     0   :  { %8 = vsyncpa [#allocation3], 0  ;;  %s6126_s0 = inlined_call_operand.vmem [shape: f32[2,1,18,18,4], index: 0, kind: input, shape index: {}]   ;;  %s6127_s1 = inlined_call_operand.vmem [shape: f32[3,3,4,128], index: 1, kind: input, shape index: {}]   ;;  %s6128_s2 = inlined_call_operand.vmem [shape: f32[1,128], index: 2, kind: input, shape index: {}]   ;;  %s6129_s3 = inlined_call_operand.hbm [shape: f32[2,1,16,16,128], index: 3, kind: output, shape index: {}]  }
   0x1   :  { %10 = vsyncpa [#allocation3 + $0x1], 0  ;;  %s4806_s12 = smov 0   ;;  %s4808_s13 = smov 0  }
   0x2   :  { %s4810_s14 = smov 0   ;;  %s4812_s15 = smov 0  }
   0x3   :  { %s4814_s16 = smov 0   ;;  %s4816_s17 = smov 0  }
   0x4 LB: > { %s3327_s18 = sadd.s32 4294967295, %s4781_s17   ;;  %s3328_s19 = sadd.s32 4294967294, %s4781_s17   ;;  %s4781_s17 = sphi %s4816_s17, %s16_s17   ;;  %s4777_s16 = sphi %s4814_s16, %s6310_s16   ;;  %s4773_s15 = sphi %s4812_s15, %s6309_s15   ;;  %s4769_s14 = sphi %s4810_s14, %s6308_s14   ;;  %s4765_s13 = sphi %s4808_s13, %s6307_s13   ;;  %s4761_s12 = sphi %s4806_s12, %s6306_s12  }
   0x5   : > { %s35_s20 = sadd.s32 1, %s4777_s16  ;;  %s126_s21 = sadd.s32 1, %s4769_s14 }
   0x6   : > { %p37_p0 = scmp.ge.s32.totalorder %s35_s20, 2  ;;  %p136_p1 = scmp.ne.s32.totalorder %s4769_s14, %s4765_s13 }
   0x7   : > { %p137_p2 = scmp.eq.s32.totalorder %s3327_s18, 1  ;;  %p142_p3 = scmp.ne.s32.totalorder %s4765_s13, %s4761_s12 }
   0x8   : > { %s6312_s20 = smov (%p37_p0, %s35_s20), 0  ;;  %p143_p5 = scmp.eq.s32.totalorder %s3328_s19, 1 }
   0x9   : > { %p4846_p4 = por %p137_p2, %p136_p1  ;;  %s119_s23 = ssub.s32 %s4777_s16, %s6312_s20 }
   0xa   : > { %p3333_p6 = scmp.ge.s32.totalorder %s4781_s17, 1  ;;  %p124_p7 = scmp.eq.s32.totalorder %s119_s23, 0 }
   0xb   : > { %p4853_p8 = por %p143_p5, %p142_p3  ;;  %p186_p9 = scmp.lt.s32.totalorder %s4781_s17, 3 }
   0xc   : > { %s4859_s25 = scalar_select %p124_p7, %s4769_s14, %s126_s21  }
   0xd   : > { %p187_p10 = pnand %p3333_p6, %p186_p9 }
   0xf   : > { %190 = sbr.rel (%p187_p10) target bundleno = 554 (0x22a), region = 32 }
  0x16   : > { %v292_v0 = vld [vmem:[%s6127_s1 + $0x4] sm:$0xf]  ;;  %vm494_vm0 = vcmask 1043456   ;;  %v4867_v1 = vld [vmem:[%s6127_s1 + $0x10] sm:$0xf]  ;;  %p221_p11 = scmp.lt.s32.totalorder %s4773_s15, 1 }
  0x17   : > { %3937 = vmatprep.subr.msk.mxu1 %vm494_vm0, %v292_v0  ;;  %4137 = vmatprep.subr.msk.mxu0 %vm494_vm0, %v4867_v1  ;;  %v291_v2 = vld [vmem:[%s6127_s1] sm:$0xf]  ;;  %v296_v3 = vld [vmem:[%s6127_s1 + $0x14] sm:$0xf]  ;;  %vm348_vm1 = vcmask 1046528   ;;  %vm429_vm2 = vcmask 31744  }
  0x18   : > { %3938 = vmatpush3.msk.msra.mxu1 %vm494_vm0, %v292_v0  ;;  %4138 = vmatpush3.msk.msra.mxu0 %vm494_vm0, %v4867_v1  ;;  %s222_s7 = scalar_select %p221_p11, %s4773_s15, 1  ;;  %v4953_v33 = vld [vmem:[%s6127_s1 + $0x18] sm:$0xf]  ;;  %v4963_v35 = vld [vmem:[%s6127_s1 + $0x8] sm:$0xf]  ;;  %vm1015_vm3 = vcmask 1045504  }
  0x19   : > { %3987 = vmatprep.subr.msk.mxu1 %vm494_vm0, %v291_v2  ;;  %4187 = vmatprep.subr.msk.mxu0 %vm494_vm0, %v296_v3  ;;  %s218_s5 = sand.u32 1, %s4765_s13   ;;  %s3639_s10 = sshll.u32 %s4773_s15, 12 }
  0x1a   : > { %s4645_s8 = smul.u32 432, %s222_s7  ;;  %s6072_s21 = scalar_lea.hbm %s6129_s3, %s3639_s10 }
  0x1b   : > { %s6080_s15 = scalar_lea.sflag [#allocation3], %s218_s5  ;;  %s4783_s26 = smov [#allocation2]  }
  0x1c   : > { %s4888_s11 = scalar_lea.vmem %s6126_s0, %s4645_s8  ;;  %s3334_s8 = sshll.u32 %s218_s5, 8 }
  0x1d   : > { %v4891_v4 = vld [vmem:[%s4888_s11] sm:$0xff]  ;;  %v4894_v5 = vld [vmem:[%s4888_s11 + $0x8] sm:$0xff]  ;;  %v4897_v6 = vld [vmem:[%s4888_s11 + $0x18] sm:$0xff]  ;;  %s5998_s9 = scalar_lea.vmem [#allocation2], %s3334_s8  ;;  %s4707_s27 = sshll.u32 %s4783_s26, 4  ;;  %s4708_s27 = int_to_ptr.vmem [resolvable:$false] %s4707_s27 }
  0x1e   : > { %6205 = vst [vmem:[#allocation5_spill] sm:$0xff] %v4897_v6  ;;  %v349_v7 = vrot.slane %v4891_v4, 1  ;;  %v350_v8 = vrot.slane %v4894_v5, 1  ;;  %v4902_v9 = vld [vmem:[%s4888_s11 + $0x20] sm:$0xff]  ;;  %v354_v10 = vrot.slane %v4897_v6, 1  ;;  %v4914_v15 = vld [vmem:[%s4888_s11 + $0x30] sm:$0xff] }
  0x1f   : > { %6206 = vst [vmem:[#allocation6_spill] sm:$0xff] %v4902_v9  ;;  %v4906_v11 = vld [vmem:[%s4888_s11 + $0x10] sm:$0x3]  ;;  %v355_v12 = vrot.slane %v4902_v9, 1  ;;  %v4911_v14 = vld [vmem:[%s4888_s11 + $0x28] sm:$0x3] }
  0x20   : > { %v352_v13 = vrot.slane %v4906_v11, 1  ;;  %v351_v16 = vsel %vm348_vm1, %v349_v7, %v350_v8  ;;  %v357_v17 = vrot.slane %v4911_v14, 1  ;;  %v4919_v18 = vld [vmem:[%s4888_s11 + $0x38] sm:$0xff]  ;;  %v359_v19 = vrot.slane %v4914_v15, 1  ;;  %v4923_v20 = vld [vmem:[%s4888_s11 + $0x40] sm:$0x3] }
  0x21   : > { %3939 = vmatprep.mubr.msk.f32.mxu1 %vm429_vm2, %v351_v16  ;;  %v356_v21 = vsel %vm348_vm1, %v354_v10, %v355_v12  ;;  %v360_v23 = vrot.slane %v4919_v18, 1  ;;  %v362_v24 = vrot.slane %v4923_v20, 1  ;;  %v4931_v25 = vld [vmem:[%s4888_s11 + $0x48] sm:$0xff]  ;;  %v4934_v26 = vld [vmem:[%s4888_s11 + $0x50] sm:$0xff]  ;;  %v4937_v27 = vld [vmem:[%s4888_s11 + $0x58] sm:$0x3] }
  0x22   : > { %v353_v22 = vsel %vm348_vm1, %v350_v8, %v352_v13  ;;  %4139 = vmatprep.mubr.msk.f32.mxu0 %vm429_vm2, %v356_v21  ;;  %v358_v28 = vsel %vm348_vm1, %v355_v12, %v357_v17  ;;  %v364_v29 = vrot.slane %v4931_v25, 1  ;;  %v365_v30 = vrot.slane %v4934_v26, 1  ;;  %v4945_v31 = vld [vmem:[%s4888_s11 + $0x60] sm:$0xff]  ;;  %v4948_v32 = vld [vmem:[%s4888_s11 + $0x68] sm:$0xff]  ;;  %v4979_v41 = vld [vmem:[%s4888_s11 + $0x70] sm:$0x3] }
  0x23   : > { %3940 = vmatmul.mubr.msk.f32.vlgmr.msra.gmra.mrb[0].mxu1 %vm429_vm2, %v353_v22  ;;  %4140 = vmatmul.mubr.msk.f32.vlgmr.msra.gmra.mrb[0].mxu0 %vm429_vm2, %v358_v28  ;;  %v4958_v34 = vsel %vm348_vm1, %v359_v19, %v360_v23  ;;  %v4968_v36 = vsel %vm348_vm1, %v360_v23, %v362_v24  ;;  %v367_v37 = vrot.slane %v4937_v27, 1  ;;  %v369_v39 = vrot.slane %v4945_v31, 1  ;;  %v4985_v42 = vld [vmem:[%s4888_s11 + $0x78] sm:$0xff]  ;;  %v4988_v43 = vld [vmem:[%s4888_s11 + $0x80] sm:$0xff]  ;;  %v5008_v49 = vld [vmem:[%s4888_s11 + $0x88] sm:$0x3] }
  0x24   : > { %3988 = vmatpush3.msk.msra.mxu1 %vm494_vm0, %v291_v2  ;;  %6207 = vst [vmem:[#allocation7_spill] sm:$0xff] %v4958_v34  ;;  %4188 = vmatpush3.msk.msra.mxu0 %vm494_vm0, %v296_v3  ;;  %6208 = vst [vmem:[#allocation8_spill] sm:$0xff] %v4968_v36  ;;  %v4974_v38 = vsel %vm348_vm1, %v364_v29, %v365_v30  ;;  %v370_v40 = vrot.slane %v4948_v32, 1  ;;  %v372_v45 = vrot.slane %v4979_v41, 1  ;;  %v374_v47 = vrot.slane %v4985_v42, 1  ;;  %v5013_v50 = vld [vmem:[%s4888_s11 + $0x90] sm:$0xff] }
  0x25   : > { %3942 = vmatprep.mubr.msk.f32.mxu1 %vm429_vm2, %v356_v21  ;;  %4142 = vmatprep.mubr.msk.f32.mxu0 %vm429_vm2, %v4958_v34  ;;  %6209 = vst [vmem:[#allocation9_spill] sm:$0xff] %v4974_v38  ;;  %v4999_v44 = vsel %vm348_vm1, %v365_v30, %v367_v37  ;;  %v375_v48 = vrot.slane %v4988_v43, 1  ;;  %v5016_v51 = vld [vmem:[%s4888_s11 + $0x98] sm:$0xff]  ;;  %v377_v53 = vrot.slane %v5008_v49, 1  ;;  %v379_v55 = vrot.slane %v5013_v50, 1  ;;  %v5039_v58 = vld [vmem:[%s4888_s11 + $0xa8] sm:$0xff] }
  0x26   : > { %4237 = vmatprep.subr.msk.mxu0 %vm494_vm0, %v4953_v33  ;;  %4037 = vmatprep.subr.msk.mxu1 %vm494_vm0, %v4963_v35  ;;  %6210 = vst [vmem:[#allocation10_spill] sm:$0xff] %v4999_v44  ;;  %v5003_v46 = vsel %vm348_vm1, %v369_v39, %v370_v40  ;;  %v5025_v52 = vsel %vm348_vm1, %v370_v40, %v372_v45  ;;  %v380_v56 = vrot.slane %v5016_v51, 1  ;;  %v5034_v57 = vld [vmem:[%s4888_s11 + $0xa0] sm:$0x3]  ;;  %v5042_v59 = vld [vmem:[%s4888_s11 + $0xb0] sm:$0xff]  ;;  %v384_v63 = vrot.slane %v5039_v58, 1 }
  0x27   : > { %3943 = vmatmul.mubr.msk.f32.gmra.mrb[2].mxu1 %vm429_vm2, %v358_v28  ;;  %4143 = vmatmul.mubr.msk.f32.gmra.mrb[2].mxu0 %vm429_vm2, %v4968_v36  ;;  %6211 = vst [vmem:[#allocation11_spill] sm:$0xff] %v5003_v46  ;;  %6212 = vst [vmem:[#allocation12_spill] sm:$0xff] %v5025_v52  ;;  %v5029_v54 = vsel %vm348_vm1, %v374_v47, %v375_v48  ;;  %v5051_v60 = vsel %vm348_vm1, %v375_v48, %v377_v53  ;;  %v382_v61 = vrot.slane %v5034_v57, 1  ;;  %v5060_v2 = vld [vmem:[%s4888_s11 + $0xb8] sm:$0x3]  ;;  %v5065_v3 = vld [vmem:[%s4888_s11 + $0xc0] sm:$0xff] }
  0x28   : > { %3945 = vmatprep.mubr.msk.f32.mxu1 %vm429_vm2, %v4958_v34  ;;  %4145 = vmatprep.mubr.msk.f32.mxu0 %vm429_vm2, %v4974_v38  ;;  %6213 = vst [vmem:[#allocation13_spill] sm:$0xff] %v5029_v54  ;;  %6214 = vst [vmem:[#allocation14_spill] sm:$0xff] %v5051_v60  ;;  %v5055_v62 = vsel %vm348_vm1, %v379_v55, %v380_v56  ;;  %v385_v0 = vrot.slane %v5042_v59, 1  ;;  %v5068_v7 = vld [vmem:[%s4888_s11 + $0xc8] sm:$0xff]  ;;  %v387_v10 = vrot.slane %v5060_v2, 1  ;;  %v389_v13 = vrot.slane %v5065_v3, 1 }
  0x29   : > { %6215 = vst [vmem:[#allocation15_spill] sm:$0xff] %v5055_v62  ;;  %v5077_v8 = vsel %vm348_vm1, %v380_v56, %v382_v61  ;;  %v390_v16 = vrot.slane %v5068_v7, 1  ;;  %v5086_v17 = vld [vmem:[%s4888_s11 + $0xd0] sm:$0x3]  ;;  %v1021_v23 = vrot.slane %v4897_v6, 2  ;;  %v1022_v24 = vrot.slane %v4902_v9, 2 }
  0x2a   : > { %6216 = vst [vmem:[#allocation16_spill] sm:$0xff] %v5077_v8  ;;  %v5081_v12 = vsel %vm348_vm1, %v384_v63, %v385_v0  ;;  %v5097_v19 = vsel %vm348_vm1, %v385_v0, %v387_v10  ;;  %v392_v21 = vrot.slane %v5086_v17, 1  ;;  %v5106_v28 = vld [vmem:[%s4888_s11 + $0xd8] sm:$0xff]  ;;  %v5109_v29 = vld [vmem:[%s4888_s11 + $0xe0] sm:$0xff]  ;;  %v1024_v30 = vrot.slane %v4911_v14, 2  ;;  %v5134_v53 = vld [vmem:[%s4888_s11 + $0xf0] sm:$0xff] }
  0x2b   : > { %3946 = vmatmul.mubr.msk.f32.gmra.mrb[4].mxu1 %vm429_vm2, %v4968_v36  ;;  %4146 = vmatmul.mubr.msk.f32.gmra.mrb[4].mxu0 %vm429_vm2, %v4999_v44  ;;  %6217 = vst [vmem:[#allocation17_spill] sm:$0xff] %v5081_v12  ;;  %6218 = vst [vmem:[#allocation18_spill] sm:$0xff] %v5097_v19  ;;  %v5101_v22 = vsel %vm348_vm1, %v389_v13, %v390_v16  ;;  %v394_v39 = vrot.slane %v5106_v28, 1  ;;  %v395_v40 = vrot.slane %v5109_v29, 1  ;;  %v5126_v45 = vld [vmem:[%s4888_s11 + $0xe8] sm:$0x3] }
  0x2c   : > { %3948 = vmatprep.mubr.msk.f32.mxu1 %vm429_vm2, %v4974_v38  ;;  %4148 = vmatprep.mubr.msk.f32.mxu0 %vm429_vm2, %v5003_v46  ;;  %6219 = vst [vmem:[#allocation19_spill] sm:$0xff] %v5101_v22  ;;  %v5121_v37 = vsel %vm348_vm1, %v390_v16, %v392_v21  ;;  %v5129_v47 = vsel %vm1015_vm3, %v1021_v23, %v1022_v24  ;;  %v1026_v48 = vrot.slane %v4914_v15, 2  ;;  %v1027_v14 = vrot.slane %v4919_v18, 2  ;;  %v5137_v55 = vld [vmem:[%s4888_s11 + $0xf8] sm:$0xff]  ;;  %v5158_v16 = vld [vmem:[%s4888_s11 + $0x100] sm:$0x3] }
  0x2d   : > { %6220 = vst [vmem:[#allocation20_spill] sm:$0xff] %v5121_v37  ;;  %v397_v56 = vrot.slane %v5126_v45, 1  ;;  %v1029_v61 = vrot.slane %v4923_v20, 2  ;;  %v5150_v63 = vsel %vm1015_vm3, %v1022_v24, %v1024_v30  ;;  %v5153_v0 = vsel %vm348_vm1, %v394_v39, %v395_v40  ;;  %v5169_v24 = vld [vmem:[%s4888_s11 + $0x110] sm:$0xff]  ;;  %v5176_v30 = vld [vmem:[%s6127_s1 + $0x1c] sm:$0xf] }
  0x2e   : > { %6221 = vst [vmem:[#allocation21_spill] sm:$0xff] %v5153_v0  ;;  %v399_v10 = vrot.slane %v5134_v53, 1  ;;  %v400_v13 = vrot.slane %v5137_v55, 1  ;;  %v5161_v21 = vsel %vm1015_vm3, %v1026_v48, %v1027_v14  ;;  %v1031_v20 = vrot.slane %v4931_v25, 2  ;;  %v5272_v36 = vld [vmem:[%s4888_s11 + $0x148] sm:$0x3] }
  0x2f   : > { %3949 = vmatmul.mubr.msk.f32.gmra.mrb[6].mxu1 %vm429_vm2, %v4999_v44  ;;  %4149 = vmatmul.mubr.msk.f32.gmra.mrb[6].mxu0 %vm429_vm2, %v5025_v52  ;;  %v1032_v23 = vrot.slane %v4934_v26, 2  ;;  %v5183_v39 = vsel %vm348_vm1, %v395_v40, %v397_v56  ;;  %v5186_v48 = vsel %vm1015_vm3, %v1027_v14, %v1029_v61  ;;  %v405_v40 = vrot.slane %v5169_v24, 1  ;;  %v5200_v56 = vld [vmem:[%s4888_s11 + $0x118] sm:$0x3]  ;;  %s4709_s28 = scalar_lea.vmem %s4708_s27, 8192 }
  0x30   : > { %3951 = vmatprep.mubr.msk.f32.mxu1 %vm429_vm2, %v5003_v46  ;;  %4151 = vmatprep.mubr.msk.f32.mxu0 %vm429_vm2, %v5029_v54  ;;  %6222 = vst [vmem:[#allocation22_spill] sm:$0xff] %v5183_v39  ;;  %6223 = vst [vmem:[#allocation23_spill] sm:$0xff] %v5186_v48  ;;  %v1036_v61 = vrot.slane %v4945_v31, 2  ;;  %v5245_v46 = vld [vmem:[%s4888_s11 + $0x138] sm:$0xff]  ;;  %v1044_v44 = vrot.slane %v5008_v49, 2  ;;  %v1049_v34 = vrot.slane %v5034_v57, 2 }
  0x31   : > { %v5203_v14 = vsel %vm1015_vm3, %v1031_v20, %v1032_v23  ;;  %v407_v20 = vrot.slane %v5200_v56, 1  ;;  %v414_v38 = vrot.slane %v5245_v46, 1  ;;  %v1051_v57 = vrot.slane %v5039_v58, 2 }
  0x32   : > { %6225 = vst [vmem:[#allocation25_spill] sm:$0xff] %v5203_v14 }
  0x33   : > { %3952 = vmatmul.mubr.msk.f32.gmra.mrb[8].mxu1 %vm429_vm2, %v5025_v52  ;;  %4152 = vmatmul.mubr.msk.f32.gmra.mrb[8].mxu0 %vm429_vm2, %v5051_v60  ;;  %v5237_v52 = vld [vmem:[%s4888_s11 + $0x130] sm:$0x3] }
  0x34   : > { %3954 = vmatprep.mubr.msk.f32.mxu1 %vm429_vm2, %v5029_v54  ;;  %4154 = vmatprep.mubr.msk.f32.mxu0 %vm429_vm2, %v5055_v62 }
  0x37   : > { %3955 = vmatmul.mubr.msk.f32.gmra.mrb[10].mxu1 %vm429_vm2, %v5051_v60  ;;  %4155 = vmatmul.mubr.msk.f32.gmra.mrb[10].mxu0 %vm429_vm2, %v5077_v8 }
  0x38   : > { %3957 = vmatprep.mubr.msk.f32.mxu1 %vm429_vm2, %v5055_v62  ;;  %4157 = vmatprep.mubr.msk.f32.mxu0 %vm429_vm2, %v5081_v12  ;;  %v1039_v62 = vrot.slane %v4979_v41, 2  ;;  %v1041_v41 = vrot.slane %v4985_v42, 2 }
  0x3b   : > { %3958 = vmatmul.mubr.msk.f32.gmra.mrb[12].mxu1 %vm429_vm2, %v5077_v8  ;;  %4158 = vmatmul.mubr.msk.f32.gmra.mrb[12].mxu0 %vm429_vm2, %v5097_v19  ;;  %v5208_v8 = vld [vmem:[%s4888_s11 + $0x120] sm:$0xff] }
  0x3c   : > { %3960 = vmatprep.mubr.msk.f32.mxu1 %vm429_vm2, %v5081_v12  ;;  %4160 = vmatprep.mubr.msk.f32.mxu0 %vm429_vm2, %v5101_v22  ;;  %v1034_v12 = vrot.slane %v4937_v27, 2  ;;  %v409_v54 = vrot.slane %v5208_v8, 1 }
  0x3e   : > { %v5229_v60 = vsel %vm1015_vm3, %v1032_v23, %v1034_v12  ;;  %v5248_v12 = vld [vmem:[%s4888_s11 + $0x140] sm:$0xff] }
  0x3f   : > { %3961 = vmatmul.mubr.msk.f32.gmra.mrb[14].mxu1 %vm429_vm2, %v5097_v19  ;;  %4161 = vmatmul.mubr.msk.f32.gmra.mrb[14].mxu0 %vm429_vm2, %v5121_v37  ;;  %v5194_v19 = vsel %vm348_vm1, %v399_v10, %v400_v13  ;;  %v5211_v10 = vld [vmem:[%s4888_s11 + $0x128] sm:$0xff]  ;;  %6227 = vst [vmem:[#allocation27_spill] sm:$0xff] %v5229_v60 }
  0x40   : > { %3963 = vmatprep.mubr.msk.f32.mxu1 %vm429_vm2, %v5101_v22  ;;  %4189 = vmatprep.mubr.msk.f32.mxu0 %vm429_vm2, %v5129_v47  ;;  %v5166_v22 = vld [vmem:[%s4888_s11 + $0x108] sm:$0xff]  ;;  %6224 = vst [vmem:[#allocation24_spill] sm:$0xff] %v5194_v19 }
  0x43   : > { %3964 = vmatmul.mubr.msk.f32.gmra.mrb[16].mxu1 %vm429_vm2, %v5121_v37  ;;  %4190 = vmatmul.mubr.msk.f32.vlgmr.msra.gmra.mrb[0].mxu0 %vm429_vm2, %v5150_v63  ;;  %v402_v37 = vrot.slane %v5158_v16, 1 }
  0x44   : > { %3966 = vmatprep.mubr.msk.f32.mxu1 %vm429_vm2, %v5153_v0  ;;  %4238 = vmatpush3.msk.msra.mxu0 %vm494_vm0, %v4953_v33  ;;  %v404_v0 = vrot.slane %v5166_v22, 1  ;;  %v1037_v33 = vrot.slane %v4948_v32, 2 }
  0x45   : > { %4192 = vmatprep.mubr.msk.f32.mxu0 %vm429_vm2, %v5161_v21  ;;  %4287 = vmatprep.subr.msk.mxu0 %vm494_vm0, %v5176_v30  ;;  %v5222_v27 = vsel %vm348_vm1, %v400_v13, %v402_v37  ;;  %v1042_v13 = vrot.slane %v4988_v43, 2 }
  0x46   : > { %6226 = vst [vmem:[#allocation26_spill] sm:$0xff] %v5222_v27  ;;  %v5240_v37 = vsel %vm1015_vm3, %v1036_v61, %v1037_v33  ;;  %v5260_v23 = vsel %vm1015_vm3, %v1037_v33, %v1039_v62  ;;  %v412_v61 = vrot.slane %v5237_v52, 1  ;;  %v1046_v62 = vrot.slane %v5013_v50, 2 }
  0x47   : > { %3967 = vmatmul.mubr.msk.f32.gmra.mrb[18].mxu1 %vm429_vm2, %v5183_v39  ;;  %4193 = vmatmul.mubr.msk.f32.gmra.mrb[2].mxu0 %vm429_vm2, %v5186_v48  ;;  %v5232_v39 = vsel %vm348_vm1, %v404_v0, %v405_v40  ;;  %6229 = vst [vmem:[#allocation29_spill] sm:$0xff] %v5240_v37  ;;  %v5257_v0 = vsel %vm348_vm1, %v405_v40, %v407_v20  ;;  %6231 = vst [vmem:[#allocation31_spill] sm:$0xff] %v5260_v23  ;;  %v1047_v33 = vrot.slane %v5016_v51, 2  ;;  %v5280_v20 = vld [vmem:[%s4888_s11 + $0x150] sm:$0xff]  ;;  %v5342_v48 = vld [vmem:[%s4888_s11 + $0x178] sm:$0x3] }
  0x48   : > { %3969 = vmatprep.mubr.msk.f32.mxu1 %vm429_vm2, %v5194_v19  ;;  %4195 = vmatprep.mubr.msk.f32.mxu0 %vm429_vm2, %v5203_v14  ;;  %6228 = vst [vmem:[#allocation28_spill] sm:$0xff] %v5232_v39  ;;  %v410_v19 = vrot.slane %v5211_v10, 1  ;;  %6230 = vst [vmem:[#allocation30_spill] sm:$0xff] %v5257_v0  ;;  %v5275_v40 = vsel %vm1015_vm3, %v1041_v41, %v1042_v13  ;;  %v417_v41 = vrot.slane %v5272_v36, 1 }
  0x49   : > { %6233 = vst [vmem:[#allocation33_spill] sm:$0xff] %v5275_v40 }
  0x4a   : > { %v5292_v49 = vsel %vm348_vm1, %v410_v19, %v412_v61  ;;  %v1052_v61 = vrot.slane %v5042_v59, 2 }
  0x4b   : > { %3970 = vmatmul.mubr.msk.f32.gmra.mrb[20].mxu1 %vm429_vm2, %v5222_v27  ;;  %4196 = vmatmul.mubr.msk.f32.gmra.mrb[4].mxu0 %vm429_vm2, %v5229_v60  ;;  %v5266_v27 = vsel %vm348_vm1, %v409_v54, %v410_v19  ;;  %v5283_v54 = vld [vmem:[%s4888_s11 + $0x158] sm:$0xff]  ;;  %6234 = vst [vmem:[#allocation34_spill] sm:$0xff] %v5292_v49  ;;  %v5307_v60 = vld [vmem:[%s4888_s11 + $0x160] sm:$0x3]  ;;  %v5310_v19 = vsel %vm1015_vm3, %v1046_v62, %v1047_v33 }
  0x4c   : > { %3972 = vmatprep.mubr.msk.f32.mxu1 %vm429_vm2, %v5232_v39  ;;  %4198 = vmatprep.mubr.msk.f32.mxu0 %vm429_vm2, %v5240_v37  ;;  %6232 = vst [vmem:[#allocation32_spill] sm:$0xff] %v5266_v27  ;;  %v415_v39 = vrot.slane %v5248_v12, 1  ;;  %v5299_v37 = vsel %vm1015_vm3, %v1042_v13, %v1044_v44  ;;  %v5318_v44 = vld [vmem:[%s4888_s11 + $0x170] sm:$0xff]  ;;  %v5330_v13 = vsel %vm1015_vm3, %v1047_v33, %v1049_v34  ;;  %v422_v62 = vrot.slane %v5307_v60, 1 }
  0x4d   : > { %6235 = vst [vmem:[#allocation35_spill] sm:$0xff] %v5299_v37  ;;  %6237 = vst [vmem:[#allocation37_spill] sm:$0xff] %v5318_v44  ;;  %v1056_v34 = vrot.slane %v5065_v3, 2  ;;  %v1057_v33 = vrot.slane %v5068_v7, 2 }
  0x4e   : > { %6239 = vst [vmem:[#allocation39_spill] sm:$0xff] %v5330_v13 }
  0x4f   : > { %3973 = vmatmul.mubr.msk.f32.gmra.mrb[22].mxu1 %vm429_vm2, %v5257_v0  ;;  %4199 = vmatmul.mubr.msk.f32.gmra.mrb[6].mxu0 %vm429_vm2, %v5260_v23  ;;  %v5302_v0 = vsel %vm348_vm1, %v414_v38, %v415_v39  ;;  %v419_v23 = vrot.slane %v5280_v20, 1  ;;  %v5327_v38 = vsel %vm348_vm1, %v415_v39, %v417_v41  ;;  %v5345_v39 = vsel %vm1015_vm3, %v1051_v57, %v1052_v61 }
  0x50   : > { %3975 = vmatprep.mubr.msk.f32.mxu1 %vm429_vm2, %v5266_v27  ;;  %4201 = vmatprep.mubr.msk.f32.mxu0 %vm429_vm2, %v5275_v40  ;;  %6236 = vst [vmem:[#allocation36_spill] sm:$0xff] %v5302_v0  ;;  %v420_v27 = vrot.slane %v5283_v54, 1  ;;  %v5315_v40 = vld [vmem:[%s4888_s11 + $0x168] sm:$0xff]  ;;  %6238 = vst [vmem:[#allocation38_spill] sm:$0xff] %v5327_v38 }
  0x52   : > { %v5336_v14 = vsel %vm348_vm1, %v419_v23, %v420_v27  ;;  %v427_v23 = vrot.slane %v5342_v48, 1 }
  0x53   : > { %3976 = vmatmul.mubr.msk.f32.gmra.mrb[24].mxu1 %vm429_vm2, %v5292_v49  ;;  %4202 = vmatmul.mubr.msk.f32.gmra.mrb[8].mxu0 %vm429_vm2, %v5299_v37  ;;  %6240 = vst [vmem:[#allocation40_spill] sm:$0xff] %v5336_v14  ;;  %v1054_v49 = vrot.slane %v5060_v2, 2  ;;  %v424_v37 = vrot.slane %v5315_v40, 1  ;;  %v5356_v2 = vsel %vm348_vm1, %v420_v27, %v422_v62  ;;  %v1062_v27 = vrot.slane %v5109_v29, 2 }
  0x54   : > { %3978 = vmatprep.mubr.msk.f32.mxu1 %vm429_vm2, %v5302_v0  ;;  %4204 = vmatprep.mubr.msk.f32.mxu0 %vm429_vm2, %v5310_v19  ;;  %v425_v0 = vrot.slane %v5318_v44, 1  ;;  %6241 = vst [vmem:[#allocation41_spill] sm:$0xff] %v5356_v2  ;;  %v1066_v62 = vrot.slane %v5134_v53, 2 }
  0x55   : > { %v5362_v41 = vsel %vm1015_vm3, %v1052_v61, %v1054_v49  ;;  %v1064_v49 = vrot.slane %v5126_v45, 2 }
  0x56   : > { %v5365_v57 = vsel %vm348_vm1, %v424_v37, %v425_v0  ;;  %v5380_v37 = vsel %vm348_vm1, %v425_v0, %v427_v23  ;;  %v5415_v23 = vld [vmem:[%s6127_s1 + $0xc] sm:$0xf] }
  0x57   : > { %3979 = vmatmul.mubr.msk.f32.gmra.mrb[26].mxu1 %vm429_vm2, %v5327_v38  ;;  %4205 = vmatmul.mubr.msk.f32.gmra.mrb[10].mxu0 %vm429_vm2, %v5330_v13  ;;  %6242 = vst [vmem:[#allocation42_spill] sm:$0xff] %v5365_v57  ;;  %v1059_v38 = vrot.slane %v5086_v17, 2  ;;  %v5369_v13 = vsel %vm1015_vm3, %v1056_v34, %v1057_v33  ;;  %6243 = vst [vmem:[#allocation43_spill] sm:$0xff] %v5380_v37  ;;  %v1067_v34 = vrot.slane %v5137_v55, 2 }
  0x58   : > { %3981 = vmatprep.mubr.msk.f32.mxu1 %vm429_vm2, %v5336_v14  ;;  %4207 = vmatprep.mubr.msk.f32.mxu0 %vm429_vm2, %v5345_v39  ;;  %v1061_v14 = vrot.slane %v5106_v28, 2  ;;  %v5402_v45 = vsel %vm1015_vm3, %v1062_v27, %v1064_v49 }
  0x59   : > { %v5385_v17 = vsel %vm1015_vm3, %v1057_v33, %v1059_v38  ;;  %v5406_v0 = vsel %vm1015_vm3, %v1066_v62, %v1067_v34  ;;  %v1071_v38 = vrot.slane %v5166_v22, 2  ;;  %v1072_v33 = vrot.slane %v5169_v24, 2 }
  0x5a   : > { %v5389_v61 = vsel %vm1015_vm3, %v1061_v14, %v1062_v27  ;;  %v1069_v14 = vrot.slane %v5158_v16, 2  ;;  %v1074_v27 = vrot.slane %v5200_v56, 2  ;;  %v1076_v62 = vrot.slane %v5208_v8, 2 }
  0x5b   : > { %3982 = vmatmul.mubr.msk.f32.gmra.mrb[28].mxu1 %vm429_vm2, %v5356_v2  ;;  %4208 = vmatmul.mubr.msk.f32.gmra.mrb[12].mxu0 %vm429_vm2, %v5362_v41  ;;  %v5430_v49 = vsel %vm1015_vm3, %v1071_v38, %v1072_v33  ;;  %v1081_v38 = vrot.slane %v5245_v46, 2  ;;  %v1092_v2 = vrot.slane %v5318_v44, 2 }
  0x5c   : > { %3984 = vmatprep.mubr.msk.f32.mxu1 %vm429_vm2, %v5365_v57  ;;  %4210 = vmatprep.mubr.msk.f32.mxu0 %vm429_vm2, %v5369_v13  ;;  %v5426_v16 = vsel %vm1015_vm3, %v1067_v34, %v1069_v14  ;;  %6244 = vst [vmem:[#allocation44_spill] sm:$0xff] %v5430_v49  ;;  %v5445_v56 = vsel %vm1015_vm3, %v1072_v33, %v1074_v27  ;;  %v1079_v34 = vrot.slane %v5237_v52, 2  ;;  %v1084_v33 = vrot.slane %v5272_v36, 2 }
  0x5d   : > { %v1087_v57 = vrot.slane %v5283_v54, 2 }
  0x5f   : > { %3985 = vmatmul.mubr.msk.f32.gmra.mrb[30].mxu1 %vm429_vm2, %v5380_v37  ;;  %4211 = vmatmul.mubr.msk.f32.gmra.mrb[14].mxu0 %vm429_vm2, %v5385_v17  ;;  %v1082_v37 = vrot.slane %v5248_v12, 2 }
  0x60   : > { %3989 = vmatprep.mubr.msk.f32.mxu1 %vm429_vm2, %v4891_v4  ;;  %4213 = vmatprep.mubr.msk.f32.mxu0 %vm429_vm2, %v5389_v61 }
  0x61   : > { %v5466_v27 = vsel %vm1015_vm3, %v1081_v38, %v1082_v37  ;;  %v5479_v36 = vsel %vm1015_vm3, %v1082_v37, %v1084_v33  ;;  %v1091_v38 = vrot.slane %v5315_v40, 2  ;;  %v1094_v37 = vrot.slane %v5342_v48, 2 }
  0x62   : > { %6246 = vst [vmem:[#allocation46_spill] sm:$0xff] %v5466_v27  ;;  %6247 = vst [vmem:[#allocation47_spill] sm:$0xff] %v5479_v36 }
  0x63   : > { %3990 = vmatmul.mubr.msk.f32.vlgmr.msra.gmra.mrb[0].mxu1 %vm429_vm2, %v4894_v5  ;;  %4214 = vmatmul.mubr.msk.f32.gmra.mrb[16].mxu0 %vm429_vm2, %v5402_v45  ;;  %v5506_v33 = vsel %vm1015_vm3, %v1091_v38, %v1092_v2  ;;  %v5522_v48 = vsel %vm1015_vm3, %v1092_v2, %v1094_v37  ;;  %v1017_v38 = vrot.slane %v4894_v5, 2  ;;  %v1019_v37 = vrot.slane %v4906_v11, 2  ;;  %v6254_v5 = vld [vmem:[#allocation23_spill] sm:$0xff]  ;;  %v6255_v11 = vld [vmem:[#allocation25_spill] sm:$0xff] }
  0x64   : > { %4038 = vmatpush3.msk.msra.mxu1 %vm494_vm0, %v4963_v35  ;;  %3992 = vmatprep.mubr.msk.f32.mxu1 %vm429_vm2, %v4897_v6  ;;  %v1077_v35 = vrot.slane %v5211_v10, 2  ;;  %v5493_v6 = vld [vmem:[%s4888_s11 + $0x188] sm:$0xff]  ;;  %6250 = vst [vmem:[#allocation50_spill] sm:$0xff] %v5506_v33  ;;  %6251 = vst [vmem:[#allocation51_spill] sm:$0xff] %v5522_v48 }
  0x65   : > { %4216 = vmatprep.mubr.msk.f32.mxu0 %vm429_vm2, %v5406_v0  ;;  %4087 = vmatprep.subr.msk.mxu1 %vm494_vm0, %v5415_v23 }
  0x66   : > { %v5449_v14 = vsel %vm1015_vm3, %v1076_v62, %v1077_v35  ;;  %v5462_v52 = vsel %vm1015_vm3, %v1077_v35, %v1079_v34  ;;  %v1086_v62 = vrot.slane %v5280_v20, 2  ;;  %v1089_v35 = vrot.slane %v5307_v60, 2 }
  0x67   : > { %3993 = vmatmul.mubr.msk.f32.gmra.mrb[2].mxu1 %vm429_vm2, %v4902_v9  ;;  %4217 = vmatmul.mubr.msk.f32.gmra.mrb[18].mxu0 %vm429_vm2, %v5426_v16  ;;  %6245 = vst [vmem:[#allocation45_spill] sm:$0xff] %v5462_v52  ;;  %v5490_v9 = vld [vmem:[%s4888_s11 + $0x180] sm:$0xff] }
  0x68   : > { %3995 = vmatprep.mubr.msk.f32.mxu1 %vm429_vm2, %v4914_v15  ;;  %4219 = vmatprep.mubr.msk.f32.mxu0 %vm429_vm2, %v5430_v49  ;;  %v5483_v34 = vsel %vm1015_vm3, %v1086_v62, %v1087_v57  ;;  %v5502_v60 = vsel %vm1015_vm3, %v1087_v57, %v1089_v35  ;;  %v1956_v62 = vrot.slane %v5490_v9, 2 }
  0x69   : > { %6248 = vst [vmem:[#allocation48_spill] sm:$0xff] %v5483_v34  ;;  %6249 = vst [vmem:[#allocation49_spill] sm:$0xff] %v5502_v60 }
  0x6b   : > { %3996 = vmatmul.mubr.msk.f32.gmra.mrb[4].mxu1 %vm429_vm2, %v4919_v18  ;;  %4220 = vmatmul.mubr.msk.f32.gmra.mrb[20].mxu0 %vm429_vm2, %v5445_v56 }
  0x6c   : > { %3998 = vmatprep.mubr.msk.f32.mxu1 %vm429_vm2, %v4931_v25  ;;  %4222 = vmatprep.mubr.msk.f32.mxu0 %vm429_vm2, %v5449_v14 }
  0x6f   : > { %3999 = vmatmul.mubr.msk.f32.gmra.mrb[6].mxu1 %vm429_vm2, %v4934_v26  ;;  %4223 = vmatmul.mubr.msk.f32.gmra.mrb[22].mxu0 %vm429_vm2, %v5462_v52  ;;  %v5511_v52 = vld [vmem:[%s4888_s11 + $0x190] sm:$0x3] }
  0x70   : > { %4001 = vmatprep.mubr.msk.f32.mxu1 %vm429_vm2, %v4945_v31  ;;  %4225 = vmatprep.mubr.msk.f32.mxu0 %vm429_vm2, %v5466_v27  ;;  %v1957_v27 = vrot.slane %v5493_v6, 2  ;;  %v1959_v57 = vrot.slane %v5511_v52, 2 }
  0x72   : > { %v5526_v35 = vsel %vm1015_vm3, %v1956_v62, %v1957_v27  ;;  %v5537_v2 = vsel %vm1015_vm3, %v1957_v27, %v1959_v57  ;;  %v5552_v27 = vld [vmem:[%s6127_s1 + $0x20] sm:$0xf] }
  0x73   : > { %4002 = vmatmul.mubr.msk.f32.gmra.mrb[8].mxu1 %vm429_vm2, %v4948_v32  ;;  %4226 = vmatmul.mubr.msk.f32.gmra.mrb[24].mxu0 %vm429_vm2, %v5479_v36  ;;  %6252 = vst [vmem:[#allocation52_spill] sm:$0xff] %v5526_v35  ;;  %6253 = vst [vmem:[#allocation53_spill] sm:$0xff] %v5537_v2  ;;  %v6259_v57 = vld [vmem:[#allocation33_spill] sm:$0xff] }
  0x74   : > { %4004 = vmatprep.mubr.msk.f32.mxu1 %vm429_vm2, %v4985_v42  ;;  %4228 = vmatprep.mubr.msk.f32.mxu0 %vm429_vm2, %v5483_v34 }
  0x77   : > { %4005 = vmatmul.mubr.msk.f32.gmra.mrb[10].mxu1 %vm429_vm2, %v4988_v43  ;;  %4229 = vmatmul.mubr.msk.f32.gmra.mrb[26].mxu0 %vm429_vm2, %v5502_v60 }
  0x78   : > { %4007 = vmatprep.mubr.msk.f32.mxu1 %vm429_vm2, %v5013_v50  ;;  %4231 = vmatprep.mubr.msk.f32.mxu0 %vm429_vm2, %v5506_v33 }
  0x7b   : > { %4008 = vmatmul.mubr.msk.f32.gmra.mrb[12].mxu1 %vm429_vm2, %v5016_v51  ;;  %4232 = vmatmul.mubr.msk.f32.gmra.mrb[28].mxu0 %vm429_vm2, %v5522_v48 }
  0x7c   : > { %4010 = vmatprep.mubr.msk.f32.mxu1 %vm429_vm2, %v5039_v58  ;;  %4234 = vmatprep.mubr.msk.f32.mxu0 %vm429_vm2, %v5526_v35  ;;  %v6264_v35 = vld [vmem:[#allocation9_spill] sm:$0xff] }
  0x7f   : > { %4011 = vmatmul.mubr.msk.f32.gmra.mrb[14].mxu1 %vm429_vm2, %v5042_v59  ;;  %4235 = vmatmul.mubr.msk.f32.gmra.mrb[30].mxu0 %vm429_vm2, %v5537_v2  ;;  %v6263_v2 = vld [vmem:[#allocation8_spill] sm:$0xff] }
  0x80   : > { %4013 = vmatprep.mubr.msk.f32.mxu1 %vm429_vm2, %v5065_v3  ;;  %4239 = vmatprep.mubr.msk.f32.mxu0 %vm429_vm2, %v4914_v15 }
  0x83   : > { %4014 = vmatmul.mubr.msk.f32.gmra.mrb[16].mxu1 %vm429_vm2, %v5068_v7  ;;  %4240 = vmatmul.mubr.msk.f32.vlgmr.msra.gmra.mrb[0].mxu0 %vm429_vm2, %v4919_v18 }
  0x84   : > { %4016 = vmatprep.mubr.msk.f32.mxu1 %vm429_vm2, %v5106_v28  ;;  %4288 = vmatpush3.msk.msra.mxu0 %vm494_vm0, %v5176_v30  ;;  %v1016_v30 = vrot.slane %v4891_v4, 2  ;;  %v1020_v4 = vsel %vm1015_vm3, %v1017_v38, %v1019_v37  ;;  %v6261_v37 = vld [vmem:[#allocation39_spill] sm:$0xff] }
  0x85   : > { %4242 = vmatprep.mubr.msk.f32.mxu0 %vm429_vm2, %v4931_v25  ;;  %4337 = vmatprep.subr.msk.mxu0 %vm494_vm0, %v5552_v27 }
  0x86   : > { %v1018_v62 = vsel %vm1015_vm3, %v1016_v30, %v1017_v38  ;;  %v6260_v30 = vld [vmem:[#allocation35_spill] sm:$0xff]  ;;  %v5676_v38 = vld [vmem:[%s4888_s11 + $0x198] sm:$0xff] }
  0x87   : > { %4017 = vmatmul.mubr.msk.f32.gmra.mrb[18].mxu1 %vm429_vm2, %v5109_v29  ;;  %4243 = vmatmul.mubr.msk.f32.gmra.mrb[2].mxu0 %vm429_vm2, %v4934_v26 }
  0x88   : > { %4019 = vmatprep.mubr.msk.f32.mxu1 %vm429_vm2, %v5134_v53  ;;  %4245 = vmatprep.mubr.msk.f32.mxu0 %vm429_vm2, %v4945_v31 }
  0x8b   : > { %4020 = vmatmul.mubr.msk.f32.gmra.mrb[20].mxu1 %vm429_vm2, %v5137_v55  ;;  %4246 = vmatmul.mubr.msk.f32.gmra.mrb[4].mxu0 %vm429_vm2, %v4948_v32 }
  0x8c   : > { %4022 = vmatprep.mubr.msk.f32.mxu1 %vm429_vm2, %v5166_v22  ;;  %4248 = vmatprep.mubr.msk.f32.mxu0 %vm429_vm2, %v4985_v42 }
  0x8f   : > { %4023 = vmatmul.mubr.msk.f32.gmra.mrb[22].mxu1 %vm429_vm2, %v5169_v24  ;;  %4249 = vmatmul.mubr.msk.f32.gmra.mrb[6].mxu0 %vm429_vm2, %v4988_v43 }
  0x90   : > { %4025 = vmatprep.mubr.msk.f32.mxu1 %vm429_vm2, %v5208_v8  ;;  %4251 = vmatprep.mubr.msk.f32.mxu0 %vm429_vm2, %v5013_v50 }
  0x93   : > { %4026 = vmatmul.mubr.msk.f32.gmra.mrb[24].mxu1 %vm429_vm2, %v5211_v10  ;;  %4252 = vmatmul.mubr.msk.f32.gmra.mrb[8].mxu0 %vm429_vm2, %v5016_v51 }
  0x94   : > { %4028 = vmatprep.mubr.msk.f32.mxu1 %vm429_vm2, %v5245_v46  ;;  %4254 = vmatprep.mubr.msk.f32.mxu0 %vm429_vm2, %v5039_v58 }
  0x97   : > { %4029 = vmatmul.mubr.msk.f32.gmra.mrb[26].mxu1 %vm429_vm2, %v5248_v12  ;;  %4255 = vmatmul.mubr.msk.f32.gmra.mrb[10].mxu0 %vm429_vm2, %v5042_v59 }
  0x98   : > { %4031 = vmatprep.mubr.msk.f32.mxu1 %vm429_vm2, %v5280_v20  ;;  %4257 = vmatprep.mubr.msk.f32.mxu0 %vm429_vm2, %v5065_v3 }
  0x9b   : > { %4032 = vmatmul.mubr.msk.f32.gmra.mrb[28].mxu1 %vm429_vm2, %v5283_v54  ;;  %4258 = vmatmul.mubr.msk.f32.gmra.mrb[12].mxu0 %vm429_vm2, %v5068_v7 }
  0x9c   : > { %4034 = vmatprep.mubr.msk.f32.mxu1 %vm429_vm2, %v5315_v40  ;;  %4260 = vmatprep.mubr.msk.f32.mxu0 %vm429_vm2, %v5106_v28 }
  0x9f   : > { %4035 = vmatmul.mubr.msk.f32.gmra.mrb[30].mxu1 %vm429_vm2, %v5318_v44  ;;  %4261 = vmatmul.mubr.msk.f32.gmra.mrb[14].mxu0 %vm429_vm2, %v5109_v29 }
  0xa0   : > { %4039 = vmatprep.mubr.msk.f32.mxu1 %vm429_vm2, %v1018_v62  ;;  %4263 = vmatprep.mubr.msk.f32.mxu0 %vm429_vm2, %v5134_v53  ;;  %v5687_v62 = vld [vmem:[%s4888_s11 + $0x1a0] sm:$0xff] }
  0xa3   : > { %4040 = vmatmul.mubr.msk.f32.vlgmr.msra.gmra.mrb[0].mxu1 %vm429_vm2, %v1020_v4  ;;  %4264 = vmatmul.mubr.msk.f32.gmra.mrb[16].mxu0 %vm429_vm2, %v5137_v55  ;;  %v6262_v4 = vld [vmem:[#allocation7_spill] sm:$0xff] }
  0xa4   : > { %4088 = vmatpush3.msk.msra.mxu1 %vm494_vm0, %v5415_v23  ;;  %4042 = vmatprep.mubr.msk.f32.mxu1 %vm429_vm2, %v5129_v47  ;;  %v6256_v47 = vld [vmem:[#allocation27_spill] sm:$0xff] }
  0xa5   : > { %4266 = vmatprep.mubr.msk.f32.mxu0 %vm429_vm2, %v5166_v22  ;;  %4387 = vmatprep.subr.msk.mxu1 %vm494_vm0, %v4867_v1  ;;  %v6258_v23 = vld [vmem:[#allocation31_spill] sm:$0xff] }
  0xa7   : > { %4043 = vmatmul.mubr.msk.f32.gmra.mrb[2].mxu1 %vm429_vm2, %v5150_v63  ;;  %4267 = vmatmul.mubr.msk.f32.gmra.mrb[18].mxu0 %vm429_vm2, %v5169_v24  ;;  %v6257_v63 = vld [vmem:[#allocation29_spill] sm:$0xff] }
  0xa8   : > { %4045 = vmatprep.mubr.msk.f32.mxu1 %vm429_vm2, %v5161_v21  ;;  %4269 = vmatprep.mubr.msk.f32.mxu0 %vm429_vm2, %v5208_v8 }
  0xab   : > { %4046 = vmatmul.mubr.msk.f32.gmra.mrb[4].mxu1 %vm429_vm2, %v6254_v5  ;;  %4270 = vmatmul.mubr.msk.f32.gmra.mrb[20].mxu0 %vm429_vm2, %v5211_v10 }
  0xac   : > { %4048 = vmatprep.mubr.msk.f32.mxu1 %vm429_vm2, %v6255_v11  ;;  %4272 = vmatprep.mubr.msk.f32.mxu0 %vm429_vm2, %v5245_v46 }
  0xaf   : > { %4049 = vmatmul.mubr.msk.f32.gmra.mrb[6].mxu1 %vm429_vm2, %v6256_v47  ;;  %4273 = vmatmul.mubr.msk.f32.gmra.mrb[22].mxu0 %vm429_vm2, %v5248_v12 }
  0xb0   : > { %4051 = vmatprep.mubr.msk.f32.mxu1 %vm429_vm2, %v6257_v63  ;;  %4275 = vmatprep.mubr.msk.f32.mxu0 %vm429_vm2, %v5280_v20 }
  0xb3   : > { %4052 = vmatmul.mubr.msk.f32.gmra.mrb[8].mxu1 %vm429_vm2, %v6258_v23  ;;  %4276 = vmatmul.mubr.msk.f32.gmra.mrb[24].mxu0 %vm429_vm2, %v5283_v54 }
  0xb4   : > { %4054 = vmatprep.mubr.msk.f32.mxu1 %vm429_vm2, %v6259_v57  ;;  %4278 = vmatprep.mubr.msk.f32.mxu0 %vm429_vm2, %v5315_v40 }
  0xb7   : > { %4055 = vmatmul.mubr.msk.f32.gmra.mrb[10].mxu1 %vm429_vm2, %v6260_v30  ;;  %4279 = vmatmul.mubr.msk.f32.gmra.mrb[26].mxu0 %vm429_vm2, %v5318_v44  ;;  %v6265_v44 = vld [vmem:[#allocation10_spill] sm:$0xff] }
  0xb8   : > { %4057 = vmatprep.mubr.msk.f32.mxu1 %vm429_vm2, %v5310_v19  ;;  %4281 = vmatprep.mubr.msk.f32.mxu0 %vm429_vm2, %v5490_v9 }
  0xbb   : > { %4058 = vmatmul.mubr.msk.f32.gmra.mrb[12].mxu1 %vm429_vm2, %v6261_v37  ;;  %4282 = vmatmul.mubr.msk.f32.gmra.mrb[28].mxu0 %vm429_vm2, %v5493_v6 }
  0xbc   : > { %4060 = vmatprep.mubr.msk.f32.mxu1 %vm429_vm2, %v5345_v39  ;;  %4284 = vmatprep.mubr.msk.f32.mxu0 %vm429_vm2, %v5676_v38 }
  0xbf   : > { %4061 = vmatmul.mubr.msk.f32.gmra.mrb[14].mxu1 %vm429_vm2, %v5362_v41  ;;  %4285 = vmatmul.mubr.msk.f32.gmra.mrb[30].mxu0 %vm429_vm2, %v5687_v62 }
  0xc0   : > { %4063 = vmatprep.mubr.msk.f32.mxu1 %vm429_vm2, %v5369_v13  ;;  %4289 = vmatprep.mubr.msk.f32.mxu0 %vm429_vm2, %v6262_v4  ;;  %v6266_v4 = vld [vmem:[#allocation11_spill] sm:$0xff] }
  0xc3   : > { %4064 = vmatmul.mubr.msk.f32.gmra.mrb[16].mxu1 %vm429_vm2, %v5385_v17  ;;  %4290 = vmatmul.mubr.msk.f32.vlgmr.msra.gmra.mrb[0].mxu0 %vm429_vm2, %v6263_v2  ;;  %v6267_v2 = vld [vmem:[#allocation12_spill] sm:$0xff] }
  0xc4   : > { %4066 = vmatprep.mubr.msk.f32.mxu1 %vm429_vm2, %v5389_v61  ;;  %4338 = vmatpush3.msk.msra.mxu0 %vm494_vm0, %v5552_v27  ;;  %v6270_v27 = vld [vmem:[#allocation15_spill] sm:$0xff] }
  0xc5   : > { %4292 = vmatprep.mubr.msk.f32.mxu0 %vm429_vm2, %v6264_v35  ;;  %v6268_v35 = vld [vmem:[#allocation13_spill] sm:$0xff] }
  0xc7   : > { %4067 = vmatmul.mubr.msk.f32.gmra.mrb[18].mxu1 %vm429_vm2, %v5402_v45  ;;  %4293 = vmatmul.mubr.msk.f32.gmra.mrb[2].mxu0 %vm429_vm2, %v6265_v44  ;;  %v6269_v44 = vld [vmem:[#allocation14_spill] sm:$0xff] }
  0xc8   : > { %4069 = vmatprep.mubr.msk.f32.mxu1 %vm429_vm2, %v5406_v0  ;;  %4295 = vmatprep.mubr.msk.f32.mxu0 %vm429_vm2, %v6266_v4  ;;  %v6271_v4 = vld [vmem:[#allocation45_spill] sm:$0xff] }
  0xcb   : > { %4070 = vmatmul.mubr.msk.f32.gmra.mrb[20].mxu1 %vm429_vm2, %v5426_v16  ;;  %4296 = vmatmul.mubr.msk.f32.gmra.mrb[4].mxu0 %vm429_vm2, %v6267_v2  ;;  %v6272_v2 = vld [vmem:[#allocation16_spill] sm:$0xff] }
  0xcc   : > { %4072 = vmatprep.mubr.msk.f32.mxu1 %vm429_vm2, %v5430_v49  ;;  %4298 = vmatprep.mubr.msk.f32.mxu0 %vm429_vm2, %v6268_v35  ;;  %v6273_v49 = vld [vmem:[#allocation46_spill] sm:$0xff]  ;;  %v6274_v35 = vld [vmem:[#allocation17_spill] sm:$0xff] }
  0xcf   : > { %4073 = vmatmul.mubr.msk.f32.gmra.mrb[22].mxu1 %vm429_vm2, %v5445_v56  ;;  %4299 = vmatmul.mubr.msk.f32.gmra.mrb[6].mxu0 %vm429_vm2, %v6269_v44  ;;  %v6275_v44 = vld [vmem:[#allocation18_spill] sm:$0xff] }
  0xd0   : > { %4075 = vmatprep.mubr.msk.f32.mxu1 %vm429_vm2, %v5449_v14  ;;  %4301 = vmatprep.mubr.msk.f32.mxu0 %vm429_vm2, %v6270_v27  ;;  %v6276_v27 = vld [vmem:[#allocation19_spill] sm:$0xff] }
  0xd3   : > { %4076 = vmatmul.mubr.msk.f32.gmra.mrb[24].mxu1 %vm429_vm2, %v6271_v4  ;;  %4302 = vmatmul.mubr.msk.f32.gmra.mrb[8].mxu0 %vm429_vm2, %v6272_v2  ;;  %v6277_v2 = vld [vmem:[#allocation20_spill] sm:$0xff] }
  0xd4   : > { %4078 = vmatprep.mubr.msk.f32.mxu1 %vm429_vm2, %v6273_v49  ;;  %4304 = vmatprep.mubr.msk.f32.mxu0 %vm429_vm2, %v6274_v35  ;;  %v6278_v35 = vld [vmem:[#allocation21_spill] sm:$0xff] }
  0xd7   : > { %4079 = vmatmul.mubr.msk.f32.gmra.mrb[26].mxu1 %vm429_vm2, %v5479_v36  ;;  %4305 = vmatmul.mubr.msk.f32.gmra.mrb[10].mxu0 %vm429_vm2, %v6275_v44  ;;  %v6279_v44 = vld [vmem:[#allocation22_spill] sm:$0xff] }
  0xd8   : > { %4081 = vmatprep.mubr.msk.f32.mxu1 %vm429_vm2, %v5483_v34  ;;  %4307 = vmatprep.mubr.msk.f32.mxu0 %vm429_vm2, %v6276_v27  ;;  %v6280_v34 = vld [vmem:[#allocation5_spill] sm:$0xff]  ;;  %v6281_v27 = vld [vmem:[#allocation24_spill] sm:$0xff]  ;;  %v5814_v36 = vld [vmem:[%s4888_s11 + $0x1a8] sm:$0x3]  ;;  %s3214_s11 = sshll.u32 %s5998_s9, 4  ;;  %s6074_s11 = int_to_ptr.vmem [resolvable:$true] %s3214_s11 }
  0xd9   : > { %s4703_s23 = scalar_lea.vmem %s6074_s11, 4096  ;;  %p4710_p1 = scmp.lt.s32.totalorder %s6074_s11, %s4708_s27 }
  0xda   : > { %p4704_p12 = scmp.ne.s32.totalorder %s6074_s11, %s4703_s23  ;;  %p4711_p2 = scmp.lt.s32.totalorder %s4709_s28, %s4703_s23 }
  0xdb   : > { %4082 = vmatmul.mubr.msk.f32.gmra.mrb[28].mxu1 %vm429_vm2, %v5502_v60  ;;  %4308 = vmatmul.mubr.msk.f32.gmra.mrb[12].mxu0 %vm429_vm2, %v6277_v2  ;;  %v6282_v60 = vld [vmem:[#allocation6_spill] sm:$0xff] }
  0xdc   : > { %4084 = vmatprep.mubr.msk.f32.mxu1 %vm429_vm2, %v5506_v33  ;;  %4310 = vmatprep.mubr.msk.f32.mxu0 %vm429_vm2, %v6278_v35  ;;  %v6283_v2 = vld [vmem:[#allocation26_spill] sm:$0xff]  ;;  %v6291_v33 = vld [vmem:[#allocation41_spill] sm:$0xff]  ;;  %p4705_p13 = pnand %p4704_p12, %p4846_p4  ;;  %p4712_p3 = por %p4711_p2, %p4710_p1 }
  0xde   : > { %p4706_p0 = pneg %p4705_p13 }
  0xdf   : > { %4085 = vmatmul.mubr.msk.f32.gmra.mrb[30].mxu1 %vm429_vm2, %v5522_v48  ;;  %4311 = vmatmul.mubr.msk.f32.gmra.mrb[14].mxu0 %vm429_vm2, %v6279_v44  ;;  %v6284_v48 = vld [vmem:[#allocation28_spill] sm:$0xff] }
  0xe0   : > { %4089 = vmatprep.mubr.msk.f32.mxu1 %vm429_vm2, %v6280_v34  ;;  %4313 = vmatprep.mubr.msk.f32.mxu0 %vm429_vm2, %v6281_v27  ;;  %v6285_v34 = vld [vmem:[#allocation30_spill] sm:$0xff]  ;;  %p4713_p5 = pnand %p4712_p3, %p4706_p0 }
  0xe3   : > { %4090 = vmatmul.mubr.msk.f32.vlgmr.msra.gmra.mrb[0].mxu1 %vm429_vm2, %v6282_v60  ;;  %4314 = vmatmul.mubr.msk.f32.gmra.mrb[16].mxu0 %vm429_vm2, %v6283_v2  ;;  %v6286_v60 = vld [vmem:[#allocation32_spill] sm:$0xff] }
  0xe4   : > { %4388 = vmatpush3.msk.msra.mxu1 %vm494_vm0, %v4867_v1  ;;  %4092 = vmatprep.mubr.msk.f32.mxu1 %vm429_vm2, %v4914_v15  ;;  %v6287_v1 = vld [vmem:[#allocation34_spill] sm:$0xff]  ;;  %v6288_v15 = vld [vmem:[#allocation36_spill] sm:$0xff] }
  0xe5   : > { %4316 = vmatprep.mubr.msk.f32.mxu0 %vm429_vm2, %v6284_v48 }
  0xe7   : > { %4093 = vmatmul.mubr.msk.f32.gmra.mrb[2].mxu1 %vm429_vm2, %v4919_v18  ;;  %4317 = vmatmul.mubr.msk.f32.gmra.mrb[18].mxu0 %vm429_vm2, %v6285_v34  ;;  %v6289_v18 = vld [vmem:[#allocation38_spill] sm:$0xff] }
  0xe8   : > { %4095 = vmatprep.mubr.msk.f32.mxu1 %vm429_vm2, %v4931_v25  ;;  %4319 = vmatprep.mubr.msk.f32.mxu0 %vm429_vm2, %v6286_v60  ;;  %v6290_v25 = vld [vmem:[#allocation40_spill] sm:$0xff] }
  0xeb   : > { %4096 = vmatmul.mubr.msk.f32.gmra.mrb[4].mxu1 %vm429_vm2, %v4934_v26  ;;  %4320 = vmatmul.mubr.msk.f32.gmra.mrb[20].mxu0 %vm429_vm2, %v6287_v1  ;;  %v1687_v26 = vrot.slane %v5490_v9, 1 }
  0xec   : > { %4098 = vmatprep.mubr.msk.f32.mxu1 %vm429_vm2, %v4945_v31  ;;  %4322 = vmatprep.mubr.msk.f32.mxu0 %vm429_vm2, %v6288_v15  ;;  %v1688_v31 = vrot.slane %v5493_v6, 1 }
  0xee   : > { %v5811_v15 = vsel %vm348_vm1, %v1687_v26, %v1688_v31 }
  0xef   : > { %4099 = vmatmul.mubr.msk.f32.gmra.mrb[6].mxu1 %vm429_vm2, %v4948_v32  ;;  %4323 = vmatmul.mubr.msk.f32.gmra.mrb[22].mxu0 %vm429_vm2, %v6289_v18  ;;  %v6292_v32 = vld [vmem:[#allocation42_spill] sm:$0xff]  ;;  %v2493_v18 = vrot.slane %v5687_v62, 1 }
  0xf0   : > { %4101 = vmatprep.mubr.msk.f32.mxu1 %vm429_vm2, %v4985_v42  ;;  %4325 = vmatprep.mubr.msk.f32.mxu0 %vm429_vm2, %v6290_v25  ;;  %v1690_v42 = vrot.slane %v5511_v52, 1  ;;  %v2492_v25 = vrot.slane %v5676_v38, 1  ;;  %v2495_v52 = vrot.slane %v5814_v36, 1 }
  0xf2   : > { %v2494_v26 = vsel %vm348_vm1, %v2492_v25, %v2493_v18 }
  0xf3   : > { %4102 = vmatmul.mubr.msk.f32.gmra.mrb[8].mxu1 %vm429_vm2, %v4988_v43  ;;  %4326 = vmatmul.mubr.msk.f32.gmra.mrb[24].mxu0 %vm429_vm2, %v6291_v33  ;;  %v6293_v43 = vld [vmem:[#allocation43_spill] sm:$0xff] }
  0xf4   : > { %4104 = vmatprep.mubr.msk.f32.mxu1 %vm429_vm2, %v5013_v50  ;;  %4328 = vmatprep.mubr.msk.f32.mxu0 %vm429_vm2, %v6292_v32  ;;  %v5825_v50 = vsel %vm348_vm1, %v1688_v31, %v1690_v42 }
  0xf7   : > { %4105 = vmatmul.mubr.msk.f32.gmra.mrb[10].mxu1 %vm429_vm2, %v5016_v51  ;;  %4329 = vmatmul.mubr.msk.f32.gmra.mrb[26].mxu0 %vm429_vm2, %v6293_v43  ;;  %v2496_v51 = vsel %vm348_vm1, %v2493_v18, %v2495_v52 }
  0xf8   : > { %4107 = vmatprep.mubr.msk.f32.mxu1 %vm429_vm2, %v5039_v58  ;;  %4331 = vmatprep.mubr.msk.f32.mxu0 %vm429_vm2, %v5811_v15  ;;  %v6297_v58 = vld [vmem:[#allocation36_spill] sm:$0xff] }
  0xfb   : > { %4108 = vmatmul.mubr.msk.f32.gmra.mrb[12].mxu1 %vm429_vm2, %v5042_v59  ;;  %4332 = vmatmul.mubr.msk.f32.gmra.mrb[28].mxu0 %vm429_vm2, %v5825_v50  ;;  %v6298_v59 = vld [vmem:[#allocation48_spill] sm:$0xff] }
  0xfc   : > { %4110 = vmatprep.mubr.msk.f32.mxu1 %vm429_vm2, %v5065_v3  ;;  %4334 = vmatprep.mubr.msk.f32.mxu0 %vm429_vm2, %v2494_v26  ;;  %v6299_v3 = vld [vmem:[#allocation38_spill] sm:$0xff] }
  0xff   : > { %4111 = vmatmul.mubr.msk.f32.gmra.mrb[14].mxu1 %vm429_vm2, %v5068_v7  ;;  %4335 = vmatmul.mubr.msk.f32.gmra.mrb[30].mxu0 %vm429_vm2, %v2496_v51  ;;  %v6300_v7 = vld [vmem:[#allocation49_spill] sm:$0xff] }
 0x100   : > { %4113 = vmatprep.mubr.msk.f32.mxu1 %vm429_vm2, %v5106_v28  ;;  %4339 = vmatprep.mubr.msk.f32.mxu0 %vm429_vm2, %v5161_v21  ;;  %v2761_v28 = vrot.slane %v5676_v38, 2  ;;  %v2764_v21 = vrot.slane %v5814_v36, 2 }
 0x103   : > { %4114 = vmatmul.mubr.msk.f32.gmra.mrb[16].mxu1 %vm429_vm2, %v5109_v29  ;;  %4340 = vmatmul.mubr.msk.f32.vlgmr.msra.gmra.mrb[0].mxu0 %vm429_vm2, %v6254_v5  ;;  %v2762_v29 = vrot.slane %v5687_v62, 2 }
 0x104   : > { %4116 = vmatprep.mubr.msk.f32.mxu1 %vm429_vm2, %v5134_v53  ;;  %4342 = vmatprep.mubr.msk.f32.mxu0 %vm429_vm2, %v6255_v11  ;;  %v6303_v53 = vld [vmem:[#allocation51_spill] sm:$0xff] }
 0x107   : > { %4117 = vmatmul.mubr.msk.f32.gmra.mrb[18].mxu1 %vm429_vm2, %v5137_v55  ;;  %4343 = vmatmul.mubr.msk.f32.gmra.mrb[2].mxu0 %vm429_vm2, %v6256_v47  ;;  %v6304_v55 = vld [vmem:[#allocation52_spill] sm:$0xff] }
 0x108   : > { %4119 = vmatprep.mubr.msk.f32.mxu1 %vm429_vm2, %v5166_v22  ;;  %4345 = vmatprep.mubr.msk.f32.mxu0 %vm429_vm2, %v6257_v63  ;;  %v6302_v22 = vld [vmem:[#allocation50_spill] sm:$0xff] }
 0x10b   : > { %4120 = vmatmul.mubr.msk.f32.gmra.mrb[20].mxu1 %vm429_vm2, %v5169_v24  ;;  %4346 = vmatmul.mubr.msk.f32.gmra.mrb[4].mxu0 %vm429_vm2, %v6258_v23  ;;  %v2763_v24 = vsel %vm1015_vm3, %v2761_v28, %v2762_v29 }
 0x10c   : > { %4122 = vmatprep.mubr.msk.f32.mxu1 %vm429_vm2, %v5208_v8  ;;  %4348 = vmatprep.mubr.msk.f32.mxu0 %vm429_vm2, %v6259_v57  ;;  %v6301_v8 = vld [vmem:[#allocation40_spill] sm:$0xff] }
 0x10f   : > { %4123 = vmatmul.mubr.msk.f32.gmra.mrb[22].mxu1 %vm429_vm2, %v5211_v10  ;;  %4349 = vmatmul.mubr.msk.f32.gmra.mrb[6].mxu0 %vm429_vm2, %v6260_v30  ;;  %v6305_v10 = vld [vmem:[#allocation53_spill] sm:$0xff] }
 0x110   : > { %4125 = vmatprep.mubr.msk.f32.mxu1 %vm429_vm2, %v5245_v46  ;;  %4351 = vmatprep.mubr.msk.f32.mxu0 %vm429_vm2, %v5310_v19  ;;  %v6294_v46 = vld [vmem:[#allocation37_spill] sm:$0xff] }
 0x113   : > { %4126 = vmatmul.mubr.msk.f32.gmra.mrb[24].mxu1 %vm429_vm2, %v5248_v12  ;;  %4352 = vmatmul.mubr.msk.f32.gmra.mrb[8].mxu0 %vm429_vm2, %v6261_v37  ;;  %v2765_v12 = vsel %vm1015_vm3, %v2762_v29, %v2764_v21 }
 0x114   : > { %4128 = vmatprep.mubr.msk.f32.mxu1 %vm429_vm2, %v5280_v20  ;;  %4354 = vmatprep.mubr.msk.f32.mxu0 %vm429_vm2, %v5345_v39 }
 0x117   : > { %4129 = vmatmul.mubr.msk.f32.gmra.mrb[26].mxu1 %vm429_vm2, %v5283_v54  ;;  %4355 = vmatmul.mubr.msk.f32.gmra.mrb[10].mxu0 %vm429_vm2, %v5362_v41 }
 0x118   : > { %4131 = vmatprep.mubr.msk.f32.mxu1 %vm429_vm2, %v5315_v40  ;;  %4357 = vmatprep.mubr.msk.f32.mxu0 %vm429_vm2, %v5369_v13 }
 0x11b   : > { %4132 = vmatmul.mubr.msk.f32.gmra.mrb[28].mxu1 %vm429_vm2, %v6294_v46  ;;  %4358 = vmatmul.mubr.msk.f32.gmra.mrb[12].mxu0 %vm429_vm2, %v5385_v17 }
 0x11c   : > { %4134 = vmatprep.mubr.msk.f32.mxu1 %vm429_vm2, %v5490_v9  ;;  %4360 = vmatprep.mubr.msk.f32.mxu0 %vm429_vm2, %v5389_v61  ;;  %v6295_v9 = vld [vmem:[#allocation44_spill] sm:$0xff] }
 0x11f   : > { %4135 = vmatmul.mubr.msk.f32.gmra.mrb[30].mxu1 %vm429_vm2, %v5493_v6  ;;  %4361 = vmatmul.mubr.msk.f32.gmra.mrb[14].mxu0 %vm429_vm2, %v5402_v45  ;;  %v6296_v6 = vld [vmem:[#allocation47_spill] sm:$0xff] }
 0x120   : > { %4163 = vmatprep.mubr.msk.f32.mxu1 %vm429_vm2, %v6278_v35  ;;  %4363 = vmatprep.mubr.msk.f32.mxu0 %vm429_vm2, %v5406_v0 }
 0x123   : > { %4164 = vmatmul.mubr.msk.f32.vlgmr.msra.gmra.mrb[16].mxu1 %vm429_vm2, %v6279_v44  ;;  %4364 = vmatmul.mubr.msk.f32.gmra.mrb[16].mxu0 %vm429_vm2, %v5426_v16 }
 0x124   : > { %4166 = vmatprep.mubr.msk.f32.mxu1 %vm429_vm2, %v6281_v27  ;;  %4366 = vmatprep.mubr.msk.f32.mxu0 %vm429_vm2, %v6295_v9 }
 0x127   : > { %4167 = vmatmul.mubr.msk.f32.gmra.mrb[18].mxu1 %vm429_vm2, %v6283_v2  ;;  %4367 = vmatmul.mubr.msk.f32.gmra.mrb[18].mxu0 %vm429_vm2, %v5445_v56 }
 0x128   : > { %4169 = vmatprep.mubr.msk.f32.mxu1 %vm429_vm2, %v6284_v48  ;;  %4369 = vmatprep.mubr.msk.f32.mxu0 %vm429_vm2, %v5449_v14  ;;  %v5991_v48 = vld [vmem:[%s6128_s2] ss:$0 sm:$0xff] }
 0x12b   : > { %4170 = vmatmul.mubr.msk.f32.gmra.mrb[20].mxu1 %vm429_vm2, %v6285_v34  ;;  %4370 = vmatmul.mubr.msk.f32.gmra.mrb[20].mxu0 %vm429_vm2, %v6271_v4 }
 0x12c   : > { %4172 = vmatprep.mubr.msk.f32.mxu1 %vm429_vm2, %v6286_v60  ;;  %4372 = vmatprep.mubr.msk.f32.mxu0 %vm429_vm2, %v6273_v49 }
 0x12f   : > { %4173 = vmatmul.mubr.msk.f32.gmra.mrb[22].mxu1 %vm429_vm2, %v6287_v1  ;;  %4373 = vmatmul.mubr.msk.f32.gmra.mrb[22].mxu0 %vm429_vm2, %v6296_v6 }
 0x130   : > { %4175 = vmatprep.mubr.msk.f32.mxu1 %vm429_vm2, %v6297_v58  ;;  %4375 = vmatprep.mubr.msk.f32.mxu0 %vm429_vm2, %v6298_v59 }
 0x133   : > { %4176 = vmatmul.mubr.msk.f32.gmra.mrb[24].mxu1 %vm429_vm2, %v6299_v3  ;;  %4376 = vmatmul.mubr.msk.f32.gmra.mrb[24].mxu0 %vm429_vm2, %v6300_v7 }
 0x134   : > { %4178 = vmatprep.mubr.msk.f32.mxu1 %vm429_vm2, %v6301_v8  ;;  %4378 = vmatprep.mubr.msk.f32.mxu0 %vm429_vm2, %v6302_v22 }
 0x137   : > { %4179 = vmatmul.mubr.msk.f32.gmra.mrb[26].mxu1 %vm429_vm2, %v6291_v33  ;;  %4379 = vmatmul.mubr.msk.f32.gmra.mrb[26].mxu0 %vm429_vm2, %v6303_v53 }
 0x138   : > { %4181 = vmatprep.mubr.msk.f32.mxu1 %vm429_vm2, %v6292_v32  ;;  %4381 = vmatprep.mubr.msk.f32.mxu0 %vm429_vm2, %v6304_v55 }
 0x13b   : > { %4182 = vmatmul.mubr.msk.f32.gmra.mrb[28].mxu1 %vm429_vm2, %v6293_v43  ;;  %4382 = vmatmul.mubr.msk.f32.gmra.mrb[28].mxu0 %vm429_vm2, %v6305_v10 }
 0x13c   : > { %4184 = vmatprep.mubr.msk.f32.mxu1 %vm429_vm2, %v5811_v15  ;;  %4384 = vmatprep.mubr.msk.f32.mxu0 %vm429_vm2, %v2763_v24 }
 0x13f   : > { %4185 = vmatmul.mubr.msk.f32.gmra.mrb[30].mxu1 %vm429_vm2, %v5825_v50  ;;  %4385 = vmatmul.mubr.msk.f32.gmra.mrb[30].mxu0 %vm429_vm2, %v2765_v12 }
 0x1b6   : > { %v4091_v40 = vpop.f32.mrb[0].mxu1 }
 0x1b7   : > { %v1495_v20 = vpop.f32.mrb[1].mxu1 }
 0x1ba   : > { %v4094_v54 = vpop.f32.mrb[2].mxu1 }
 0x1bb   : > { %v1505_v19 = vpop.f32.mrb[3].mxu1 }
 0x1be   : > { %v4097_v13 = vpop.f32.mrb[4].mxu1 }
 0x1bf   : > { %v1515_v39 = vpop.f32.mrb[5].mxu1 }
 0x1c2   : > { %v4100_v41 = vpop.f32.mrb[6].mxu1 }
 0x1c3   : > { %v1525_v17 = vpop.f32.mrb[7].mxu1 }
 0x1c6   : > { %v5971_v61 = vpop.f32.mrb[8].mxu1 }
 0x1c7   : > { %v5973_v45 = vpop.f32.mrb[9].mxu1 }
 0x1ca   : > { %v5975_v0 = vpop.f32.mrb[10].mxu1 }
 0x1cb   : > { %v5977_v16 = vpop.f32.mrb[11].mxu1 }
 0x1ce   : > { %v5979_v49 = vpop.f32.mrb[12].mxu1 }
 0x1cf   : > { %v5981_v56 = vpop.f32.mrb[13].mxu1 }
 0x1d2   : > { %v5983_v14 = vpop.f32.mrb[14].mxu1 }
 0x1d3   : > { %v5985_v36 = vpop.f32.mrb[15].mxu1 }
 0x1d6   : > { %v4341_v33 = vpop.f32.mrb[0].mxu0 }
 0x1d7   : > { %v4389_v5 = vadd.f32 %v4341_v33, %v4091_v40  ;;  %v2839_v11 = vpop.f32.mrb[1].mxu0 }
 0x1d8   : > { %v4390_v47 = vadd.f32 %v2839_v11, %v1495_v20 }
 0x1d9   : > { %v3038_v63 = vadd.f32 %v4389_v5, %v5991_v48 }
 0x1da   : > { %v3037_v23 = vadd.f32 %v4390_v47, %v5991_v48  ;;  %v4344_v57 = vpop.f32.mrb[2].mxu0 }
 0x1db   : > { %vm3070_vm4 = vcmp.gt.f32.partialorder %v3038_v63, 0.0  ;;  %v3102_v30 = vmul.f32 0.1, %v3038_v63  ;;  %v4391_v38 = vadd.f32 %v4344_v57, %v4094_v54  ;;  %v2849_v37 = vpop.f32.mrb[3].mxu0 }
 0x1dc   : > { %vm3069_vm5 = vcmp.gt.f32.partialorder %v3037_v23, 0.0  ;;  %v3101_v62 = vmul.f32 0.1, %v3037_v23  ;;  %v4392_v4 = vadd.f32 %v2849_v37, %v1505_v19 }
 0x1dd   : > { %v3134_v35 = vsel %vm3070_vm4, %v3038_v63, %v3102_v30  ;;  %v3040_v44 = vadd.f32 %v4391_v38, %v5991_v48 }
 0x1de   : > { %3166 = vst [vmem:[%s5998_s9 + $0x8] sm:$0xff] %v3134_v35  ;;  %v3133_v27 = vsel %vm3069_vm5, %v3037_v23, %v3101_v62  ;;  %v3039_v2 = vadd.f32 %v4392_v4, %v5991_v48  ;;  %v4347_v34 = vpop.f32.mrb[4].mxu0 }
 0x1df   : > { %3165 = vst [vmem:[%s5998_s9] sm:$0xff] %v3133_v27  ;;  %vm3072_vm6 = vcmp.gt.f32.partialorder %v3040_v44, 0.0  ;;  %v3104_v60 = vmul.f32 0.1, %v3040_v44  ;;  %v4393_v1 = vadd.f32 %v4347_v34, %v4097_v13  ;;  %v2859_v15 = vpop.f32.mrb[5].mxu0 }
 0x1e0   : > { %vm3071_vm7 = vcmp.gt.f32.partialorder %v3039_v2, 0.0  ;;  %v3103_v18 = vmul.f32 0.1, %v3039_v2  ;;  %v4394_v25 = vadd.f32 %v2859_v15, %v1515_v39 }
 0x1e1   : > { %v3136_v31 = vsel %vm3072_vm6, %v3040_v44, %v3104_v60  ;;  %v3042_v32 = vadd.f32 %v4393_v1, %v5991_v48 }
 0x1e2   : > { %3168 = vst [vmem:[%s5998_s9 + $0x18] sm:$0xff] %v3136_v31  ;;  %v3135_v42 = vsel %vm3071_vm7, %v3039_v2, %v3103_v18  ;;  %v3041_v43 = vadd.f32 %v4394_v25, %v5991_v48  ;;  %v4350_v50 = vpop.f32.mrb[6].mxu0 }
 0x1e3   : > { %3167 = vst [vmem:[%s5998_s9 + $0x10] sm:$0xff] %v3135_v42  ;;  %vm3074_vm8 = vcmp.gt.f32.partialorder %v3042_v32, 0.0  ;;  %v3106_v52 = vmul.f32 0.1, %v3042_v32  ;;  %v4395_v26 = vadd.f32 %v4350_v50, %v4100_v41  ;;  %v2869_v51 = vpop.f32.mrb[7].mxu0 }
 0x1e4   : > { %vm3073_vm9 = vcmp.gt.f32.partialorder %v3041_v43, 0.0  ;;  %v3105_v46 = vmul.f32 0.1, %v3041_v43  ;;  %v4396_v9 = vadd.f32 %v2869_v51, %v1525_v17 }
 0x1e5   : > { %v3138_v6 = vsel %vm3074_vm8, %v3042_v32, %v3106_v52  ;;  %v3044_v58 = vadd.f32 %v4395_v26, %v5991_v48 }
 0x1e6   : > { %3170 = vst [vmem:[%s5998_s9 + $0x28] sm:$0xff] %v3138_v6  ;;  %v3137_v59 = vsel %vm3073_vm9, %v3041_v43, %v3105_v46  ;;  %v3043_v3 = vadd.f32 %v4396_v9, %v5991_v48  ;;  %v4353_v7 = vpop.f32.mrb[8].mxu0 }
 0x1e7   : > { %3169 = vst [vmem:[%s5998_s9 + $0x20] sm:$0xff] %v3137_v59  ;;  %vm3076_vm10 = vcmp.gt.f32.partialorder %v3044_v58, 0.0  ;;  %v3108_v8 = vmul.f32 0.1, %v3044_v58  ;;  %v4397_v22 = vadd.f32 %v4353_v7, %v5971_v61  ;;  %v2879_v28 = vpop.f32.mrb[9].mxu0 }
 0x1e8   : > { %vm3075_vm11 = vcmp.gt.f32.partialorder %v3043_v3, 0.0  ;;  %v3107_v29 = vmul.f32 0.1, %v3043_v3  ;;  %v4398_v53 = vadd.f32 %v2879_v28, %v5973_v45 }
 0x1e9   : > { %v3140_v55 = vsel %vm3076_vm10, %v3044_v58, %v3108_v8  ;;  %v3046_v21 = vadd.f32 %v4397_v22, %v5991_v48 }
 0x1ea   : > { %3172 = vst [vmem:[%s5998_s9 + $0x38] sm:$0xff] %v3140_v55  ;;  %v3139_v24 = vsel %vm3075_vm11, %v3043_v3, %v3107_v29  ;;  %v3045_v10 = vadd.f32 %v4398_v53, %v5991_v48  ;;  %v4356_v12 = vpop.f32.mrb[10].mxu0 }
 0x1eb   : > { %3171 = vst [vmem:[%s5998_s9 + $0x30] sm:$0xff] %v3139_v24  ;;  %vm3078_vm12 = vcmp.gt.f32.partialorder %v3046_v21, 0.0  ;;  %v3110_v40 = vmul.f32 0.1, %v3046_v21  ;;  %v4399_v20 = vadd.f32 %v4356_v12, %v5975_v0  ;;  %v2889_v54 = vpop.f32.mrb[11].mxu0 }
 0x1ec   : > { %vm3077_vm13 = vcmp.gt.f32.partialorder %v3045_v10, 0.0  ;;  %v3109_v19 = vmul.f32 0.1, %v3045_v10  ;;  %v4400_v13 = vadd.f32 %v2889_v54, %v5977_v16 }
 0x1ed   : > { %v3142_v39 = vsel %vm3078_vm12, %v3046_v21, %v3110_v40  ;;  %v3048_v41 = vadd.f32 %v4399_v20, %v5991_v48 }
 0x1ee   : > { %3174 = vst [vmem:[%s5998_s9 + $0x48] sm:$0xff] %v3142_v39  ;;  %v3141_v17 = vsel %vm3077_vm13, %v3045_v10, %v3109_v19  ;;  %v3047_v61 = vadd.f32 %v4400_v13, %v5991_v48  ;;  %v4359_v45 = vpop.f32.mrb[12].mxu0 }
 0x1ef   : > { %3173 = vst [vmem:[%s5998_s9 + $0x40] sm:$0xff] %v3141_v17  ;;  %vm3080_vm14 = vcmp.gt.f32.partialorder %v3048_v41, 0.0  ;;  %v3112_v33 = vmul.f32 0.1, %v3048_v41  ;;  %v4401_v0 = vadd.f32 %v4359_v45, %v5979_v49  ;;  %v2899_v5 = vpop.f32.mrb[13].mxu0 }
 0x1f0   : > { %vm3079_vm15 = vcmp.gt.f32.partialorder %v3047_v61, 0.0  ;;  %v3111_v11 = vmul.f32 0.1, %v3047_v61  ;;  %v4402_v16 = vadd.f32 %v2899_v5, %v5981_v56 }
 0x1f1   : > { %v3144_v47 = vsel %vm3080_vm14, %v3048_v41, %v3112_v33  ;;  %v3050_v63 = vadd.f32 %v4401_v0, %v5991_v48 }
 0x1f2   : > { %3176 = vst [vmem:[%s5998_s9 + $0x58] sm:$0xff] %v3144_v47  ;;  %v3143_v23 = vsel %vm3079_vm15, %v3047_v61, %v3111_v11  ;;  %v3049_v57 = vadd.f32 %v4402_v16, %v5991_v48  ;;  %v4362_v30 = vpop.f32.mrb[14].mxu0 }
 0x1f3   : > { %3175 = vst [vmem:[%s5998_s9 + $0x50] sm:$0xff] %v3143_v23  ;;  %vm3082_vm0 = vcmp.gt.f32.partialorder %v3050_v63, 0.0  ;;  %v3114_v38 = vmul.f32 0.1, %v3050_v63  ;;  %v4403_v49 = vadd.f32 %v4362_v30, %v5983_v14  ;;  %v2909_v37 = vpop.f32.mrb[15].mxu0 }
 0x1f4   : > { %vm3081_vm1 = vcmp.gt.f32.partialorder %v3049_v57, 0.0  ;;  %v3113_v62 = vmul.f32 0.1, %v3049_v57  ;;  %v4404_v56 = vadd.f32 %v2909_v37, %v5985_v36 }
 0x1f5   : > { %v3146_v4 = vsel %vm3082_vm0, %v3050_v63, %v3114_v38  ;;  %v3052_v35 = vadd.f32 %v4403_v49, %v5991_v48 }
 0x1f6   : > { %v4165_v44 = vpop.f32.mrb[16].mxu1  ;;  %3178 = vst [vmem:[%s5998_s9 + $0x68] sm:$0xff] %v3146_v4  ;;  %v3145_v27 = vsel %vm3081_vm1, %v3049_v57, %v3113_v62  ;;  %v3051_v2 = vadd.f32 %v4404_v56, %v5991_v48  ;;  %v4365_v34 = vpop.f32.mrb[16].mxu0 }
 0x1f7   : > { %v1845_v60 = vpop.f32.mrb[17].mxu1  ;;  %3177 = vst [vmem:[%s5998_s9 + $0x60] sm:$0xff] %v3145_v27  ;;  %vm3084_vm2 = vcmp.gt.f32.partialorder %v3052_v35, 0.0  ;;  %v3116_v14 = vmul.f32 0.1, %v3052_v35  ;;  %v4405_v1 = vadd.f32 %v4365_v34, %v4165_v44  ;;  %v2919_v15 = vpop.f32.mrb[17].mxu0 }
 0x1f8   : > { %vm3083_vm3 = vcmp.gt.f32.partialorder %v3051_v2, 0.0  ;;  %v3115_v18 = vmul.f32 0.1, %v3051_v2  ;;  %v4406_v36 = vadd.f32 %v2919_v15, %v1845_v60 }
 0x1f9   : > { %v3148_v25 = vsel %vm3084_vm2, %v3052_v35, %v3116_v14  ;;  %v3054_v31 = vadd.f32 %v4405_v1, %v5991_v48 }
 0x1fa   : > { %v4168_v32 = vpop.f32.mrb[18].mxu1  ;;  %3180 = vst [vmem:[%s5998_s9 + $0x78] sm:$0xff] %v3148_v25  ;;  %v3147_v42 = vsel %vm3083_vm3, %v3051_v2, %v3115_v18  ;;  %v3053_v43 = vadd.f32 %v4406_v36, %v5991_v48  ;;  %v4368_v50 = vpop.f32.mrb[18].mxu0 }
 0x1fb   : > { %v1855_v52 = vpop.f32.mrb[19].mxu1  ;;  %3179 = vst [vmem:[%s5998_s9 + $0x70] sm:$0xff] %v3147_v42  ;;  %vm3086_vm4 = vcmp.gt.f32.partialorder %v3054_v31, 0.0  ;;  %v3118_v26 = vmul.f32 0.1, %v3054_v31  ;;  %v4407_v51 = vadd.f32 %v4368_v50, %v4168_v32  ;;  %v2929_v46 = vpop.f32.mrb[19].mxu0 }
 0x1fc   : > { %vm3085_vm5 = vcmp.gt.f32.partialorder %v3053_v43, 0.0  ;;  %v3117_v9 = vmul.f32 0.1, %v3053_v43  ;;  %v4408_v6 = vadd.f32 %v2929_v46, %v1855_v52 }
 0x1fd   : > { %v3150_v58 = vsel %vm3086_vm4, %v3054_v31, %v3118_v26  ;;  %v3056_v59 = vadd.f32 %v4407_v51, %v5991_v48 }
 0x1fe   : > { %v4171_v3 = vpop.f32.mrb[20].mxu1  ;;  %3182 = vst [vmem:[%s5998_s9 + $0x88] sm:$0xff] %v3150_v58  ;;  %v3149_v7 = vsel %vm3085_vm5, %v3053_v43, %v3117_v9  ;;  %v3055_v8 = vadd.f32 %v4408_v6, %v5991_v48  ;;  %v4371_v22 = vpop.f32.mrb[20].mxu0 }
 0x1ff   : > { %v1865_v28 = vpop.f32.mrb[21].mxu1  ;;  %3181 = vst [vmem:[%s5998_s9 + $0x80] sm:$0xff] %v3149_v7  ;;  %vm3088_vm6 = vcmp.gt.f32.partialorder %v3056_v59, 0.0  ;;  %v3120_v29 = vmul.f32 0.1, %v3056_v59  ;;  %v4409_v53 = vadd.f32 %v4371_v22, %v4171_v3  ;;  %v2939_v55 = vpop.f32.mrb[21].mxu0 }
 0x200   : > { %vm3087_vm7 = vcmp.gt.f32.partialorder %v3055_v8, 0.0  ;;  %v3119_v21 = vmul.f32 0.1, %v3055_v8  ;;  %v4410_v24 = vadd.f32 %v2939_v55, %v1865_v28 }
 0x201   : > { %v3152_v10 = vsel %vm3088_vm6, %v3056_v59, %v3120_v29  ;;  %v3058_v12 = vadd.f32 %v4409_v53, %v5991_v48 }
 0x202   : > { %v4174_v40 = vpop.f32.mrb[22].mxu1  ;;  %3184 = vst [vmem:[%s5998_s9 + $0x98] sm:$0xff] %v3152_v10  ;;  %v3151_v20 = vsel %vm3087_vm7, %v3055_v8, %v3119_v21  ;;  %v3057_v54 = vadd.f32 %v4410_v24, %v5991_v48  ;;  %v4374_v19 = vpop.f32.mrb[22].mxu0 }
 0x203   : > { %v1875_v13 = vpop.f32.mrb[23].mxu1  ;;  %3183 = vst [vmem:[%s5998_s9 + $0x90] sm:$0xff] %v3151_v20  ;;  %vm3090_vm8 = vcmp.gt.f32.partialorder %v3058_v12, 0.0  ;;  %v3122_v39 = vmul.f32 0.1, %v3058_v12  ;;  %v4411_v41 = vadd.f32 %v4374_v19, %v4174_v40  ;;  %v2949_v17 = vpop.f32.mrb[23].mxu0 }
 0x204   : > { %vm3089_vm9 = vcmp.gt.f32.partialorder %v3057_v54, 0.0  ;;  %v3121_v61 = vmul.f32 0.1, %v3057_v54  ;;  %v4412_v45 = vadd.f32 %v2949_v17, %v1875_v13 }
 0x205   : > { %v3154_v33 = vsel %vm3090_vm8, %v3058_v12, %v3122_v39  ;;  %v3060_v0 = vadd.f32 %v4411_v41, %v5991_v48 }
 0x206   : > { %v4177_v5 = vpop.f32.mrb[24].mxu1  ;;  %3186 = vst [vmem:[%s5998_s9 + $0xa8] sm:$0xff] %v3154_v33  ;;  %v3153_v11 = vsel %vm3089_vm9, %v3057_v54, %v3121_v61  ;;  %v3059_v16 = vadd.f32 %v4412_v45, %v5991_v48  ;;  %v4377_v47 = vpop.f32.mrb[24].mxu0 }
 0x207   : > { %v1885_v63 = vpop.f32.mrb[25].mxu1  ;;  %3185 = vst [vmem:[%s5998_s9 + $0xa0] sm:$0xff] %v3153_v11  ;;  %vm3092_vm10 = vcmp.gt.f32.partialorder %v3060_v0, 0.0  ;;  %v3124_v23 = vmul.f32 0.1, %v3060_v0  ;;  %v4413_v57 = vadd.f32 %v4377_v47, %v4177_v5  ;;  %v2959_v30 = vpop.f32.mrb[25].mxu0 }
 0x208   : > { %vm3091_vm11 = vcmp.gt.f32.partialorder %v3059_v16, 0.0  ;;  %v3123_v38 = vmul.f32 0.1, %v3059_v16  ;;  %v4414_v49 = vadd.f32 %v2959_v30, %v1885_v63 }
 0x209   : > { %v3156_v37 = vsel %vm3092_vm10, %v3060_v0, %v3124_v23  ;;  %v3062_v62 = vadd.f32 %v4413_v57, %v5991_v48 }
 0x20a   : > { %v4180_v56 = vpop.f32.mrb[26].mxu1  ;;  %3188 = vst [vmem:[%s5998_s9 + $0xb8] sm:$0xff] %v3156_v37  ;;  %v3155_v4 = vsel %vm3091_vm11, %v3059_v16, %v3123_v38  ;;  %v3061_v35 = vadd.f32 %v4414_v49, %v5991_v48  ;;  %v4380_v44 = vpop.f32.mrb[26].mxu0 }
 0x20b   : > { %v1895_v27 = vpop.f32.mrb[27].mxu1  ;;  %3187 = vst [vmem:[%s5998_s9 + $0xb0] sm:$0xff] %v3155_v4  ;;  %vm3094_vm12 = vcmp.gt.f32.partialorder %v3062_v62, 0.0  ;;  %v3126_v2 = vmul.f32 0.1, %v3062_v62  ;;  %v4415_v34 = vadd.f32 %v4380_v44, %v4180_v56  ;;  %v2969_v60 = vpop.f32.mrb[27].mxu0 }
 0x20c   : > { %vm3093_vm13 = vcmp.gt.f32.partialorder %v3061_v35, 0.0  ;;  %v3125_v14 = vmul.f32 0.1, %v3061_v35  ;;  %v4416_v1 = vadd.f32 %v2969_v60, %v1895_v27 }
 0x20d   : > { %v3158_v15 = vsel %vm3094_vm12, %v3062_v62, %v3126_v2  ;;  %v3064_v18 = vadd.f32 %v4415_v34, %v5991_v48 }
 0x20e   : > { %v4183_v36 = vpop.f32.mrb[28].mxu1  ;;  %3190 = vst [vmem:[%s5998_s9 + $0xc8] sm:$0xff] %v3158_v15  ;;  %v3157_v25 = vsel %vm3093_vm13, %v3061_v35, %v3125_v14  ;;  %v3063_v31 = vadd.f32 %v4416_v1, %v5991_v48  ;;  %v4383_v32 = vpop.f32.mrb[28].mxu0 }
 0x20f   : > { %v1905_v42 = vpop.f32.mrb[29].mxu1  ;;  %3189 = vst [vmem:[%s5998_s9 + $0xc0] sm:$0xff] %v3157_v25  ;;  %vm3096_vm14 = vcmp.gt.f32.partialorder %v3064_v18, 0.0  ;;  %v3128_v43 = vmul.f32 0.1, %v3064_v18  ;;  %v4417_v50 = vadd.f32 %v4383_v32, %v4183_v36  ;;  %v2979_v52 = vpop.f32.mrb[29].mxu0 }
 0x210   : > { %vm3095_vm15 = vcmp.gt.f32.partialorder %v3063_v31, 0.0  ;;  %v3127_v26 = vmul.f32 0.1, %v3063_v31  ;;  %v4418_v51 = vadd.f32 %v2979_v52, %v1905_v42 }
 0x211   : > { %v3160_v46 = vsel %vm3096_vm14, %v3064_v18, %v3128_v43  ;;  %v3066_v9 = vadd.f32 %v4417_v50, %v5991_v48 }
 0x212   : > { %v4186_v6 = vpop.f32.mrb[30].mxu1  ;;  %3192 = vst [vmem:[%s5998_s9 + $0xd8] sm:$0xff] %v3160_v46  ;;  %v3159_v58 = vsel %vm3095_vm15, %v3063_v31, %v3127_v26  ;;  %v3065_v59 = vadd.f32 %v4418_v51, %v5991_v48  ;;  %v4386_v3 = vpop.f32.mrb[30].mxu0 }
 0x213   : > { %v1915_v7 = vpop.f32.mrb[31].mxu1  ;;  %3191 = vst [vmem:[%s5998_s9 + $0xd0] sm:$0xff] %v3159_v58  ;;  %vm3098_vm0 = vcmp.gt.f32.partialorder %v3066_v9, 0.0  ;;  %v3130_v8 = vmul.f32 0.1, %v3066_v9  ;;  %v4419_v22 = vadd.f32 %v4386_v3, %v4186_v6  ;;  %v2989_v28 = vpop.f32.mrb[31].mxu0 }
 0x214   : > { %vm3097_vm1 = vcmp.gt.f32.partialorder %v3065_v59, 0.0  ;;  %v3129_v29 = vmul.f32 0.1, %v3065_v59  ;;  %v4420_v53 = vadd.f32 %v2989_v28, %v1915_v7 }
 0x215   : > { %v3162_v55 = vsel %vm3098_vm0, %v3066_v9, %v3130_v8  ;;  %v3068_v21 = vadd.f32 %v4419_v22, %v5991_v48 }
 0x216   : > { %3194 = vst [vmem:[%s5998_s9 + $0xe8] sm:$0xff] %v3162_v55  ;;  %v3161_v24 = vsel %vm3097_vm1, %v3065_v59, %v3129_v29  ;;  %v3067_v10 = vadd.f32 %v4420_v53, %v5991_v48 }
 0x217   : > { %3193 = vst [vmem:[%s5998_s9 + $0xe0] sm:$0xff] %v3161_v24  ;;  %vm3100_vm2 = vcmp.gt.f32.partialorder %v3068_v21, 0.0  ;;  %v3132_v12 = vmul.f32 0.1, %v3068_v21 }
 0x218   : > { %vm3099_vm3 = vcmp.gt.f32.partialorder %v3067_v10, 0.0  ;;  %v3131_v40 = vmul.f32 0.1, %v3067_v10 }
 0x219   : > { %v3164_v20 = vsel %vm3100_vm2, %v3068_v21, %v3132_v12 }
 0x21a   : > { %3196 = vst [vmem:[%s5998_s9 + $0xf8] sm:$0xff] %v3164_v20  ;;  %v3163_v54 = vsel %vm3099_vm3, %v3067_v10, %v3131_v40 }
 0x21b   : > { %3195 = vst [vmem:[%s5998_s9 + $0xf0] sm:$0xff] %v3163_v54 }
 0x21c   : > { %4716 = shalt.err (!%p4713_p5)
}
 0x21d   : > { %s4717_s29 = scalar_lea.hbm %s6072_s21, 4096  ;;  %s4721_s5 = scalar_lea.hbm %s6129_s3, 8192 }
 0x21e   : > { %p4718_p6 = scmp.ne.s32.totalorder %s6072_s21, %s4717_s29  ;;  %p4722_p10 = scmp.lt.u32.totalorder %s6072_s21, %s6129_s3 }
 0x21f   : > { %p4723_p11 = scmp.lt.u32.totalorder %s4721_s5, %s4717_s29  ;;  %p4725_p13 = scmp.lt.u32.totalorder %s4717_s29, %s6072_s21 }
 0x220   : > { %p4719_p7 = pnand %p4718_p6, %p4846_p4 }
 0x221   : > { %p4724_p12 = por %p4723_p11, %p4722_p10 }
 0x222   : > { %p4720_p9 = pneg %p4719_p7 }
 0x223   : > { %p4726_p0 = por %p4725_p13, %p4724_p12 }
 0x225   : > { %p4727_p1 = pnand %p4726_p0, %p4720_p9 }
 0x227   : > { %4730 = shalt.err (!%p4727_p1)
}
 0x228   : > { %s4784_s8 = smov 128   ;;  %s4785_s9 = smov 8  }
 0x229   : > { %4646 = dma.vmem_to_hbm [thread:$0]  (%p4846_p4), %s6074_s11, 4096, %s6072_s21, %s6080_s15, %s4784_s8, %s4784_s8, %s4785_s9  }
 0x22a PF: > { %p4652_p2 = scmp.ge.s32.totalorder %s4781_s17, 2  ;;  %s3229_s10 = sand.u32 1, %s4761_s12  }
 0x22b   : > { %s3230_s18 = scalar_lea.sflag [#allocation3], %s3229_s10 }
 0x22c   : > { %p4649_p3 = pnand %p4652_p2, %p4853_p8 }
 0x22e   : > { %4756 = dma.done.wait (!%p4649_p3), %s3230_s18, 4096  }
 0x22f   : > { %4758 = vsyncadd (!%p4649_p3), %s3230_s18, 4294963200  ;;  %s16_s17 = sadd.s32 1, %s4781_s17   ;;  %s6306_s12 = smov %s4765_s13 }
 0x230   : > { %p13_p5 = scmp.ge.s32.totalorder %s16_s17, 4   ;;  %s6307_s13 = smov %s4769_s14 }
 0x231   : > { %s6308_s14 = smov %s4859_s25  ;;  %s6309_s15 = smov %s4777_s16 }
 0x232   : > { %s6310_s16 = smov %s6312_s20  ;;  %15 = sbr.rel (!%p13_p5) target bundleno = 4 (0x4), region = 73 }
 0x239   :  { %3235 = vsyncpa [#allocation3], 1 }
 0x23a   :  { %3237 = vsyncpa [#allocation3 + $0x1], 1 }

</bundles_post_ra>
